<compile_context>
chip_gen: v7x
topology: tpu7x:2x2x1
jax: 0.10.0
libtpu: 0.0.40
codegen_flags: <defaults>
</compile_context>

<pallas_src>
import functools

import numpy as np

import jax
import jax.numpy as jnp
from jax import lax
from jax.experimental import pallas as pl
from jax.experimental.pallas import tpu as pltpu

# ----------------------------- configuration --------------------------------
D_MODEL = 32
EXPAND = 2
D_STATE = 16
D_CONV = 4
HEADDIM = 16
NGROUPS = 1

D_INNER = EXPAND * D_MODEL                                  # 64
NHEADS = D_INNER // HEADDIM                                 # 4
CONV_DIM = D_INNER + 2 * NGROUPS * D_STATE                  # 96
D_IN_PROJ = 2 * D_INNER + 2 * NGROUPS * D_STATE + NHEADS    # 164

P = HEADDIM
H = NHEADS
G = NGROUPS
N = D_STATE
HP = H * P                                                  # 64

# packed in_proj weight slab offsets (each slab starts on a 128-lane boundary)
Z_OFF, XBC_OFF, DT_OFF = 0, 128, 256
W_PACK_COLS = 384

assert G == 1  # TODO(synk): generalize grouped B/C for ngroups > 1


# ----------------------------- Pallas kernel ---------------------------------
def _mamba2_kernel(u_ref, w_in_ref, pb_ref, woutT_ref, o_ref,
                   state_ref, halo_ref, *, sub_chunk):
    """Fused in_proj + causal depthwise conv1d + SiLU + chunked SSD + gate +
    out_proj for one (batch, outer-chunk) grid cell.

    u_ref     : (1, K*C, d_model)      input block (K sub-chunks of length C)
    w_in_ref  : (d_model, 384)         packed in_proj [z|pad|xBC|pad|dt_e|pad]
    pb_ref    : (8, 128)               packed small params
                                       rows 0..3 conv_w, 4 conv_b,
                                       5 dt_bias_e, 6 A_e, 7 D_e
    woutT_ref : (d_model, d_inner)     out_proj weight, transposed
    o_ref     : (1, d_model, K*C)      output block (transposed layout)
    state_ref : (N, H*P)               SSM state carried across grid steps
    halo_ref  : (d_conv-1, conv_dim)   conv-input tail of previous block
    """
    f32 = jnp.float32
    KC = u_ref.shape[1]
    C = sub_chunk
    K = KC // C

    # --- reset per-batch carries at the first outer chunk ---------------------
    @pl.when(pl.program_id(1) == 0)
    def _():
        state_ref[...] = jnp.zeros_like(state_ref)
        halo_ref[...] = jnp.zeros_like(halo_ref)

    # --- packed small parameters (single (8,128) tile) -------------------------
    pb = pb_ref[...].astype(f32)
    cw = pb[0:D_CONV, 0:CONV_DIM]                             # (4, 96)
    cb = pb[D_CONV:D_CONV + 1, 0:CONV_DIM]                    # (1, 96)
    dtb = pb[D_CONV + 1:D_CONV + 2, 0:HP]                     # (1, 64)
    A_e = pb[D_CONV + 2:D_CONV + 3, 0:HP]                     # (1, 64)
    D_e = pb[D_CONV + 3:D_CONV + 4, 0:HP]                     # (1, 64)

    # --- fused in_proj over the whole K*C block (one padded matmul) -----------
    u = u_ref[0].astype(f32)                                            # (KC, 32)
    zxw = jnp.dot(u, w_in_ref[...].astype(f32), preferred_element_type=f32)
    z = zxw[:, Z_OFF:Z_OFF + D_INNER]                                   # (KC, 64)
    xbc = zxw[:, XBC_OFF:XBC_OFF + CONV_DIM]                            # (KC, 96)
    dt_raw = zxw[:, DT_OFF:DT_OFF + HP]                                 # (KC, 64)

    # --- causal depthwise conv1d (+bias, SiLU) via shifted adds ----------------
    ext = jnp.concatenate([halo_ref[...], xbc], axis=0)       # (KC + d_conv-1, 96)
    halo_ref[...] = xbc[KC - (D_CONV - 1):, :]                # carry for next block
    conv = ext[0:KC, :] * cw[0:1, :]
    for k in range(1, D_CONV):
        conv = conv + ext[k:k + KC, :] * cw[k:k + 1, :]
    conv = conv + cb
    xconv = conv * jax.nn.sigmoid(conv)                       # SiLU

    x = xconv[:, 0:D_INNER]                                   # (KC, 64)
    Bm_all = xconv[:, D_INNER:D_INNER + N]                    # (KC, 16)
    Cm_all = xconv[:, D_INNER + N:D_INNER + 2 * N]            # (KC, 16)

    # --- head-expanded (lane-dense) dt path ------------------------------------
    dt = jax.nn.softplus(dt_raw + dtb)                        # (KC, 64)
    a_all = dt * A_e                                          # (KC, 64), <= 0
    xdt_all = x * dt                                          # (KC, 64)

    # hoisted constants for the sub-chunk loop
    t_i = lax.broadcasted_iota(jnp.int32, (C, C), 0)
    s_i = lax.broadcasted_iota(jnp.int32, (C, C), 1)
    causal = s_i <= t_i                                       # (C, C) bool
    # one-hot selector: picks column h*P -> per-head cumsum laid out along lanes
    sel = (lax.broadcasted_iota(jnp.int32, (H, HP), 1)
           == lax.broadcasted_iota(jnp.int32, (H, HP), 0) * P).astype(f32)

    state = state_ref[...]                                    # (N, 64)
    y_parts = []
    for kk in range(K):                                       # unrolled at trace time
        lo = kk * C
        a = a_all[lo:lo + C, :]
        Bm = Bm_all[lo:lo + C, :]
        Cm = Cm_all[lo:lo + C, :]
        xdt = xdt_all[lo:lo + C, :]

        # inclusive cumsum of a over the sub-chunk (log-step shifted adds)
        acum = a
        shift = 1
        while shift < C:
            shifted = jnp.concatenate(
                [jnp.zeros((shift, HP), f32), acum[:C - shift, :]], axis=0)
            acum = acum + shifted
            shift *= 2

        row_e = jnp.exp(acum)                                 # (C, 64), <= 1
        # per-head cumsum rows (H, C): tiny one-hot matmul acting as a transpose
        acum_rows = lax.dot_general(sel, acum, (((1,), (1,)), ((), ())),
                                    preferred_element_type=f32)

        CB = lax.dot_general(Cm, Bm, (((1,), (1,)), ((), ())),
                             preferred_element_type=f32)      # (C, C) = C_t . B_s

        # within-chunk (diagonal-block) term: stable segsum decay per head
        y_heads = []
        for h in range(H):
            diff = acum[:, h * P:h * P + 1] - acum_rows[h:h + 1, :]   # (C, C)
            Lh = jnp.exp(jnp.where(causal, diff, -1e30))              # <= 1, masked
            y_heads.append(jnp.dot(CB * Lh, xdt[:, h * P:(h + 1) * P],
                                   preferred_element_type=f32))       # (C, P)
        y_diag = jnp.concatenate(y_heads, axis=1)             # (C, 64)

        # inter-chunk (carried-state) term
        y_off = row_e * jnp.dot(Cm, state, preferred_element_type=f32)
        y_parts.append(y_diag + y_off)

        # state recurrence (all factors bounded: acum_end - acum_s <= 0)
        decay_chunk = row_e[C - 1:C, :]                       # (1, 64)
        colrel = jnp.exp(acum[C - 1:C, :] - acum)             # (C, 64), <= 1
        state = state * decay_chunk + lax.dot_general(
            Bm, xdt * colrel, (((0,), (0,)), ((), ())),
            preferred_element_type=f32)                       # (N, 64)

    state_ref[...] = state
    y = jnp.concatenate(y_parts, axis=0) if K > 1 else y_parts[0]     # (KC, 64)

    # --- D skip, silu(z) gate, out_proj (transposed -> lane-dense store) ------
    y = y + x * D_e
    y = y * (z * jax.nn.sigmoid(z))
    out_T = lax.dot_general(woutT_ref[...].astype(f32), y,
                            (((1,), (1,)), ((), ())),
                            preferred_element_type=f32)       # (32, KC)
    o_ref[0] = out_T.astype(o_ref.dtype)


# --------------------------- host-side param packing -------------------------
def _pack_params(params):
    w_in, conv_w, conv_b, dt_bias, A_log, D_param, w_out = params
    f32 = jnp.float32
    A_neg = -jnp.exp(A_log.astype(f32))                       # (H,)

    # split in_proj weight and pad each slab to a 128-lane boundary; dt slab is
    # pre-expanded to H*P lanes so the kernel's dt path is lane-dense.
    w_z = w_in[:, :D_INNER].astype(f32)
    w_xbc = w_in[:, D_INNER:D_INNER + CONV_DIM].astype(f32)
    w_dt = w_in[:, D_INNER + CONV_DIM:].astype(f32)           # (32, H)
    w_dt_e = jnp.repeat(w_dt, P, axis=1)                      # (32, 64)
    w_pack = jnp.concatenate([
        w_z, jnp.zeros((D_MODEL, 128 - D_INNER), f32),
        w_xbc, jnp.zeros((D_MODEL, 128 - CONV_DIM), f32),
        w_dt_e, jnp.zeros((D_MODEL, 128 - HP), f32)], axis=1)  # (32, 384)

    # pack all tiny params into a single (8, 128) block (one vreg tile)
    pb = jnp.zeros((8, 128), f32)
    pb = pb.at[0:D_CONV, 0:CONV_DIM].set(conv_w.astype(f32))
    pb = pb.at[D_CONV, 0:CONV_DIM].set(conv_b.astype(f32))
    pb = pb.at[D_CONV + 1, 0:HP].set(jnp.repeat(dt_bias.astype(f32), P))
    pb = pb.at[D_CONV + 2, 0:HP].set(jnp.repeat(A_neg, P))
    pb = pb.at[D_CONV + 3, 0:HP].set(jnp.repeat(D_param.astype(f32), P))

    w_out_T = w_out.astype(f32).T                             # (32, 64)
    return w_pack, pb, w_out_T


# ------------------------------ full forward ---------------------------------
def mamba2_forward(u, params, chunk_size=128, sub_chunks=2):
    """u: (B, L, d_model) -> (B, L, d_model)."""
    B_, L_, _ = u.shape
    C = min(chunk_size, L_)
    K = sub_chunks
    KC = K * C
    assert L_ % KC == 0, "seqlen must be divisible by sub_chunks * chunk_size"
    assert KC % 8 == 0 and KC >= D_CONV - 1
    assert KC == L_ or KC % 128 == 0, "K*C must be lane-dense (mult of 128) or == L"
    n_outer = L_ // KC

    w_pack, pb, w_out_T = _pack_params(params)
    full = lambda b, c: (0, 0)

    out_t = pl.pallas_call(
        functools.partial(_mamba2_kernel, sub_chunk=C),
        out_shape=jax.ShapeDtypeStruct((B_, D_MODEL, L_), jnp.float32),
        grid=(B_, n_outer),
        in_specs=[
            pl.BlockSpec((1, KC, D_MODEL), lambda b, c: (b, c, 0)),
            pl.BlockSpec((D_MODEL, W_PACK_COLS), full),
            pl.BlockSpec((8, 128), full),
            pl.BlockSpec((D_MODEL, D_INNER), full),
        ],
        out_specs=pl.BlockSpec((1, D_MODEL, KC), lambda b, c: (b, 0, c)),
        scratch_shapes=[
            pltpu.VMEM((G * N, HP), jnp.float32),              # SSM state carry
            pltpu.VMEM((D_CONV - 1, CONV_DIM), jnp.float32),   # conv halo carry
        ],
        compiler_params=pltpu.CompilerParams(
            dimension_semantics=("parallel", "arbitrary"),
        ),
    )(u, w_pack, pb, w_out_T)

    # kernel stores out^T for lane-dense stores; flip back to (B, L, d_model)
    return jnp.swapaxes(out_t, 1, 2)


# ------------------------- pure-JAX reference (sanity) ------------------------
def mamba2_reference(u, params):
    w_in, conv_w, conv_b, dt_bias, A_log, D_param, w_out = params
    B_, L_, _ = u.shape
    zx = (u.reshape(-1, D_MODEL) @ w_in).reshape(B_, L_, D_IN_PROJ)
    z = zx[..., :D_INNER]
    xBC = zx[..., D_INNER:D_INNER + CONV_DIM]
    dtr = zx[..., D_INNER + CONV_DIM:]

    xpad = jnp.pad(xBC, ((0, 0), (D_CONV - 1, 0), (0, 0)))
    conv = jnp.broadcast_to(conv_b[None, None, :], (B_, L_, CONV_DIM))
    for k in range(D_CONV):
        conv = conv + conv_w[k][None, None, :] * xpad[:, k:k + L_, :]
    xact = conv * jax.nn.sigmoid(conv)

    x = xact[..., :D_INNER].reshape(B_, L_, H, P)
    Bm = xact[..., D_INNER:D_INNER + G * N].reshape(B_, L_, G, N)
    Cm = xact[..., D_INNER + G * N:].reshape(B_, L_, G, N)
    dt = jax.nn.softplus(dtr + dt_bias)                         # (B, L, H)
    A = -jnp.exp(A_log.astype(jnp.float32))                     # (H,)
    hpg = H // G
    Bh = jnp.repeat(Bm, hpg, axis=2)                            # (B, L, H, N)
    Ch = jnp.repeat(Cm, hpg, axis=2)

    def step(carry, inp):
        x_t, B_t, C_t, dt_t = inp
        dA = jnp.exp(dt_t * A)                                  # (B, H)
        carry = (dA[..., None, None] * carry +
                 (dt_t[..., None, None] * x_t[..., None]) * B_t[:, :, None, :])
        y_t = jnp.sum(carry * C_t[:, :, None, :], axis=-1)      # (B, H, P)
        return carry, y_t

    init = jnp.zeros((B_, H, P, N), jnp.float32)
    xs = (x.transpose(1, 0, 2, 3), Bh.transpose(1, 0, 2, 3),
          Ch.transpose(1, 0, 2, 3), dt.transpose(1, 0, 2))
    _, ys = lax.scan(step, init, xs)
    y = ys.transpose(1, 0, 2, 3)                                # (B, L, H, P)
    y = y + D_param[None, None, :, None] * x
    y = y.reshape(B_, L_, D_INNER)
    y = y * (z * jax.nn.sigmoid(z))
    return (y.reshape(-1, D_INNER) @ w_out).reshape(B_, L_, D_MODEL)


# ------------------------------ parameter init --------------------------------
def init_params(key):
    k_in, k_cw, k_cb, k_dt, k_A, k_out = jax.random.split(key, 6)
    w_in = jax.random.normal(k_in, (D_MODEL, D_IN_PROJ), jnp.float32) * 0.2
    conv_w = jax.random.normal(k_cw, (D_CONV, CONV_DIM), jnp.float32) * 0.3
    conv_b = jax.random.normal(k_cb, (CONV_DIM,), jnp.float32) * 0.1

    # dt_bias init exactly as in the torch module
    dt_min, dt_max, dt_init_floor = 0.001, 0.1, 1e-4
    u01 = jax.random.uniform(k_dt, (H,), jnp.float32)
    dt = jnp.exp(u01 * (jnp.log(dt_max) - jnp.log(dt_min)) + jnp.log(dt_min))
    dt = jnp.maximum(dt, dt_init_floor)
    dt_bias = dt + jnp.log(-jnp.expm1(-dt))                     # inverse softplus

    A = jax.random.uniform(k_A, (H,), jnp.float32, minval=1.0, maxval=16.0)
    A_log = jnp.log(A)
    D_param = jnp.ones((H,), jnp.float32)

    w_out = jax.random.normal(k_out, (D_INNER, D_MODEL), jnp.float32) * 0.2
    return (w_in, conv_w, conv_b, dt_bias, A_log, D_param, w_out)


# ------------------------------------ main ------------------------------------
if __name__ == "__main__":
    key = jax.random.PRNGKey(0)
    k_u1, k_u2, k_p = jax.random.split(key, 3)
    params = init_params(k_p)

    # Small case: one outer grid step, 2 in-kernel sub-chunks (exercises the
    # intra-step state/conv-halo carry).
    u1 = jax.random.normal(k_u1, (2, 16, D_MODEL), jnp.float32)
    out1 = jax.block_until_ready(mamba2_forward(u1, params,
                                                chunk_size=8, sub_chunks=2))
    assert out1.shape == (2, 16, D_MODEL)
    assert bool(jnp.all(jnp.isfinite(out1)))
    ref1 = jax.block_until_ready(mamba2_reference(u1, params))
    np.testing.assert_allclose(np.asarray(out1), np.asarray(ref1),
                               rtol=2e-2, atol=2e-3)

    # Realistic case: chunk_size=128, K=2 sub-chunks per step, 4 outer grid
    # steps -> exercises the cross-grid-step SSM-state / conv-halo carry and
    # the numerically-stable segsum decay at the production chunk size.
    u2 = jax.random.normal(k_u2, (2, 1024, D_MODEL), jnp.float32)
    out2 = jax.block_until_ready(mamba2_forward(u2, params,
                                                chunk_size=128, sub_chunks=2))
    assert out2.shape == (2, 1024, D_MODEL)
    assert bool(jnp.all(jnp.isfinite(out2)))
    ref2 = jax.block_until_ready(mamba2_reference(u2, params))
    np.testing.assert_allclose(np.asarray(out2), np.asarray(ref2),
                               rtol=2e-2, atol=5e-3)

    print("KERNEL_OK")
</pallas_src>

<mosaic_0001>
module attributes {stable_mosaic.version = 11 : i64} {
  func.func @_mamba2_kernel(%arg0: i32, %arg1: i32, %arg2: memref<1x16x32xf32, #tpu.memory_space<vmem>>, %arg3: memref<32x384xf32, #tpu.memory_space<vmem>>, %arg4: memref<8x128xf32, #tpu.memory_space<vmem>>, %arg5: memref<32x64xf32, #tpu.memory_space<vmem>>, %arg6: memref<1x32x16xf32, #tpu.memory_space<vmem>>, %arg7: memref<16x64xf32, #tpu.memory_space<vmem>>, %arg8: memref<3x96xf32, #tpu.memory_space<vmem>>) attributes {dimension_semantics = [#tpu.dimension_semantics<parallel>, #tpu.dimension_semantics<arbitrary>], iteration_bounds = array<i64: 2, 1>, scalar_prefetch = 0 : i64, scratch_operands = 2 : i64, tpu.core_type = #tpu.core_type<tc>, window_params = [{transform_indices = @transform_0, window_bounds = array<i64: 1, 16, 32>}, {pipeline_mode = #tpu.pipeline_mode<synchronous>, transform_indices = @transform_1, window_bounds = array<i64: 32, 384>}, {pipeline_mode = #tpu.pipeline_mode<synchronous>, transform_indices = @transform_2, window_bounds = array<i64: 8, 128>}, {pipeline_mode = #tpu.pipeline_mode<synchronous>, transform_indices = @transform_3, window_bounds = array<i64: 32, 64>}, {transform_indices = @transform_4, window_bounds = array<i64: 1, 32, 16>}]} {
    %c0_i32 = arith.constant 0 : i32
    %0 = arith.cmpi eq, %arg1, %c0_i32 : i32
    %1 = arith.extui %0 : i1 to i32
    %c0_i32_0 = arith.constant 0 : i32
    %2 = arith.cmpi ne, %1, %c0_i32_0 : i32
    scf.if %2 {
      %cst_55 = arith.constant 0.000000e+00 : f32
      %251 = vector.broadcast %cst_55 : f32 to vector<16x64xf32>
      %c0_56 = arith.constant 0 : index
      %c0_57 = arith.constant 0 : index
      %252 = vector.load %arg7[%c0_56, %c0_57] : memref<16x64xf32, #tpu.memory_space<vmem>>, vector<16x64xf32>
      tpu.vector_store %arg7[%c0_56, %c0_57], %251 {strides = array<i32>} : memref<16x64xf32, #tpu.memory_space<vmem>>, vector<16x64xf32>,
      %cst_58 = arith.constant 0.000000e+00 : f32
      %253 = vector.broadcast %cst_58 : f32 to vector<3x96xf32>
      %c0_59 = arith.constant 0 : index
      %c0_60 = arith.constant 0 : index
      %254 = vector.load %arg8[%c0_59, %c0_60] : memref<3x96xf32, #tpu.memory_space<vmem>>, vector<3x96xf32>
      tpu.vector_store %arg8[%c0_59, %c0_60], %253 {strides = array<i32>} : memref<3x96xf32, #tpu.memory_space<vmem>>, vector<3x96xf32>,
    } else {
    }
    %c0 = arith.constant 0 : index
    %c0_1 = arith.constant 0 : index
    %3 = vector.load %arg4[%c0, %c0_1] : memref<8x128xf32, #tpu.memory_space<vmem>>, vector<8x128xf32>
    %4 = vector.extract_strided_slice %3 {offsets = [0, 0], sizes = [4, 96], strides = [1, 1]} : vector<8x128xf32> to vector<4x96xf32>
    %5 = vector.extract_strided_slice %3 {offsets = [4, 0], sizes = [1, 96], strides = [1, 1]} : vector<8x128xf32> to vector<1x96xf32>
    %6 = vector.extract_strided_slice %3 {offsets = [5, 0], sizes = [1, 64], strides = [1, 1]} : vector<8x128xf32> to vector<1x64xf32>
    %7 = vector.extract_strided_slice %3 {offsets = [6, 0], sizes = [1, 64], strides = [1, 1]} : vector<8x128xf32> to vector<1x64xf32>
    %8 = vector.extract_strided_slice %3 {offsets = [7, 0], sizes = [1, 64], strides = [1, 1]} : vector<8x128xf32> to vector<1x64xf32>
    %c0_2 = arith.constant 0 : index
    %c0_3 = arith.constant 0 : index
    %c0_4 = arith.constant 0 : index
    %9 = vector.load %arg2[%c0_2, %c0_3, %c0_4] : memref<1x16x32xf32, #tpu.memory_space<vmem>>, vector<1x16x32xf32>
    %10 = vector.shape_cast %9 : vector<1x16x32xf32> to vector<16x32xf32>
    %c0_5 = arith.constant 0 : index
    %c0_6 = arith.constant 0 : index
    %11 = vector.load %arg3[%c0_5, %c0_6] : memref<32x384xf32, #tpu.memory_space<vmem>>, vector<32x384xf32>
    %cst = arith.constant dense<0.000000e+00> : vector<16x384xf32>
    %12 = tpu.matmul %10, %11, %cst {dimension_numbers = #tpu.dot_dimension_numbers<[1], [0], [0], [1], [0, 0, 1, 1], [], []>} : vector<16x32xf32>, vector<32x384xf32>, vector<16x384xf32> -> vector<16x384xf32>
    %13 = vector.extract_strided_slice %12 {offsets = [0, 0], sizes = [16, 64], strides = [1, 1]} : vector<16x384xf32> to vector<16x64xf32>
    %14 = vector.extract_strided_slice %12 {offsets = [0, 128], sizes = [16, 96], strides = [1, 1]} : vector<16x384xf32> to vector<16x96xf32>
    %15 = vector.extract_strided_slice %12 {offsets = [0, 256], sizes = [16, 64], strides = [1, 1]} : vector<16x384xf32> to vector<16x64xf32>
    %c0_7 = arith.constant 0 : index
    %c0_8 = arith.constant 0 : index
    %16 = vector.load %arg8[%c0_7, %c0_8] : memref<3x96xf32, #tpu.memory_space<vmem>>, vector<3x96xf32>
    %17 = tpu.concatenate %16, %14 in 0 : vector<3x96xf32>, vector<16x96xf32> -> vector<19x96xf32>
    %18 = vector.extract_strided_slice %14 {offsets = [13, 0], sizes = [3, 96], strides = [1, 1]} : vector<16x96xf32> to vector<3x96xf32>
    %c0_9 = arith.constant 0 : index
    %c0_10 = arith.constant 0 : index
    %19 = vector.load %arg8[%c0_9, %c0_10] : memref<3x96xf32, #tpu.memory_space<vmem>>, vector<3x96xf32>
    tpu.vector_store %arg8[%c0_9, %c0_10], %18 {strides = array<i32>} : memref<3x96xf32, #tpu.memory_space<vmem>>, vector<3x96xf32>,
    %20 = vector.extract_strided_slice %17 {offsets = [0, 0], sizes = [16, 96], strides = [1, 1]} : vector<19x96xf32> to vector<16x96xf32>
    %21 = vector.extract_strided_slice %4 {offsets = [0, 0], sizes = [1, 96], strides = [1, 1]} : vector<4x96xf32> to vector<1x96xf32>
    %22 = vector.broadcast %21 : vector<1x96xf32> to vector<16x96xf32>
    %23 = arith.mulf %20, %22 : vector<16x96xf32>
    %24 = vector.extract_strided_slice %17 {offsets = [1, 0], sizes = [16, 96], strides = [1, 1]} : vector<19x96xf32> to vector<16x96xf32>
    %25 = vector.extract_strided_slice %4 {offsets = [1, 0], sizes = [1, 96], strides = [1, 1]} : vector<4x96xf32> to vector<1x96xf32>
    %26 = vector.broadcast %25 : vector<1x96xf32> to vector<16x96xf32>
    %27 = arith.mulf %24, %26 : vector<16x96xf32>
    %28 = arith.addf %23, %27 : vector<16x96xf32>
    %29 = vector.extract_strided_slice %17 {offsets = [2, 0], sizes = [16, 96], strides = [1, 1]} : vector<19x96xf32> to vector<16x96xf32>
    %30 = vector.extract_strided_slice %4 {offsets = [2, 0], sizes = [1, 96], strides = [1, 1]} : vector<4x96xf32> to vector<1x96xf32>
    %31 = vector.broadcast %30 : vector<1x96xf32> to vector<16x96xf32>
    %32 = arith.mulf %29, %31 : vector<16x96xf32>
    %33 = arith.addf %28, %32 : vector<16x96xf32>
    %34 = vector.extract_strided_slice %17 {offsets = [3, 0], sizes = [16, 96], strides = [1, 1]} : vector<19x96xf32> to vector<16x96xf32>
    %35 = vector.extract_strided_slice %4 {offsets = [3, 0], sizes = [1, 96], strides = [1, 1]} : vector<4x96xf32> to vector<1x96xf32>
    %36 = vector.broadcast %35 : vector<1x96xf32> to vector<16x96xf32>
    %37 = arith.mulf %34, %36 : vector<16x96xf32>
    %38 = arith.addf %33, %37 : vector<16x96xf32>
    %39 = vector.broadcast %5 : vector<1x96xf32> to vector<16x96xf32>
    %40 = arith.addf %38, %39 : vector<16x96xf32>
    %41 = arith.negf %40 : vector<16x96xf32>
    %42 = math.exp %41 : vector<16x96xf32>
    %cst_11 = arith.constant 1.000000e+00 : f32
    %43 = vector.broadcast %cst_11 : f32 to vector<16x96xf32>
    %44 = arith.addf %43, %42 : vector<16x96xf32>
    %45 = arith.divf %43, %44 : vector<16x96xf32>
    %46 = arith.mulf %40, %45 : vector<16x96xf32>
    %47 = vector.extract_strided_slice %46 {offsets = [0, 0], sizes = [16, 64], strides = [1, 1]} : vector<16x96xf32> to vector<16x64xf32>
    %48 = vector.extract_strided_slice %46 {offsets = [0, 64], sizes = [16, 16], strides = [1, 1]} : vector<16x96xf32> to vector<16x16xf32>
    %49 = vector.extract_strided_slice %46 {offsets = [0, 80], sizes = [16, 16], strides = [1, 1]} : vector<16x96xf32> to vector<16x16xf32>
    %50 = vector.broadcast %6 : vector<1x64xf32> to vector<16x64xf32>
    %51 = arith.addf %15, %50 : vector<16x64xf32>
    %cst_12 = arith.constant 0.000000e+00 : f32
    %52 = vector.broadcast %cst_12 : f32 to vector<16x64xf32>
    %53 = arith.maximumf %51, %52 : vector<16x64xf32>
    %54 = vector.broadcast %cst_12 : f32 to vector<16x64xf32>
    %55 = arith.subf %51, %54 : vector<16x64xf32>
    %56 = arith.cmpf one, %55, %55 : vector<16x64xf32>
    %57 = vector.broadcast %cst_12 : f32 to vector<16x64xf32>
    %58 = arith.addf %51, %57 : vector<16x64xf32>
    %59 = math.absf %55 : vector<16x64xf32>
    %cst_13 = arith.constant 0.000000e+00 : f32
    %60 = vector.broadcast %cst_13 : f32 to vector<16x64xf32>
    %61 = arith.subf %60, %59 : vector<16x64xf32>
    %62 = math.exp %61 : vector<16x64xf32>
    %63 = math.log1p %62 : vector<16x64xf32>
    %64 = arith.addf %53, %63 : vector<16x64xf32>
    %65 = arith.select %56, %58, %64 : vector<16x64xi1>, vector<16x64xf32>
    %66 = vector.broadcast %7 : vector<1x64xf32> to vector<16x64xf32>
    %67 = arith.mulf %65, %66 : vector<16x64xf32>
    %68 = arith.mulf %47, %65 : vector<16x64xf32>
    %69 = tpu.iota {dimensions = array<i32: 0>} : vector<8x8xi32>
    %70 = tpu.iota {dimensions = array<i32: 1>} : vector<8x8xi32>
    %71 = arith.cmpi sle, %70, %69 : vector<8x8xi32>
    %72 = tpu.iota {dimensions = array<i32: 1>} : vector<4x64xi32>
    %73 = tpu.iota {dimensions = array<i32: 0>} : vector<4x64xi32>
    %c16_i32 = arith.constant 16 : i32
    %74 = vector.broadcast %c16_i32 : i32 to vector<4x64xi32>
    %75 = arith.muli %73, %74 : vector<4x64xi32>
    %76 = arith.cmpi eq, %72, %75 : vector<4x64xi32>
    %77 = arith.extui %76 : vector<4x64xi1> to vector<4x64xi32>
    %78 = arith.sitofp %77 : vector<4x64xi32> to vector<4x64xf32>
    %c0_14 = arith.constant 0 : index
    %c0_15 = arith.constant 0 : index
    %79 = vector.load %arg7[%c0_14, %c0_15] : memref<16x64xf32, #tpu.memory_space<vmem>>, vector<16x64xf32>
    %80 = vector.extract_strided_slice %67 {offsets = [0, 0], sizes = [8, 64], strides = [1, 1]} : vector<16x64xf32> to vector<8x64xf32>
    %81 = vector.extract_strided_slice %48 {offsets = [0, 0], sizes = [8, 16], strides = [1, 1]} : vector<16x16xf32> to vector<8x16xf32>
    %82 = vector.extract_strided_slice %49 {offsets = [0, 0], sizes = [8, 16], strides = [1, 1]} : vector<16x16xf32> to vector<8x16xf32>
    %83 = vector.extract_strided_slice %68 {offsets = [0, 0], sizes = [8, 64], strides = [1, 1]} : vector<16x64xf32> to vector<8x64xf32>
    %cst_16 = arith.constant 0.000000e+00 : f32
    %84 = vector.broadcast %cst_16 : f32 to vector<1x64xf32>
    %85 = vector.extract_strided_slice %80 {offsets = [0, 0], sizes = [7, 64], strides = [1, 1]} : vector<8x64xf32> to vector<7x64xf32>
    %86 = tpu.concatenate %84, %85 in 0 : vector<1x64xf32>, vector<7x64xf32> -> vector<8x64xf32>
    %87 = arith.addf %80, %86 : vector<8x64xf32>
    %cst_17 = arith.constant 0.000000e+00 : f32
    %88 = vector.broadcast %cst_17 : f32 to vector<2x64xf32>
    %89 = vector.extract_strided_slice %87 {offsets = [0, 0], sizes = [6, 64], strides = [1, 1]} : vector<8x64xf32> to vector<6x64xf32>
    %90 = tpu.concatenate %88, %89 in 0 : vector<2x64xf32>, vector<6x64xf32> -> vector<8x64xf32>
    %91 = arith.addf %87, %90 : vector<8x64xf32>
    %cst_18 = arith.constant 0.000000e+00 : f32
    %92 = vector.broadcast %cst_18 : f32 to vector<4x64xf32>
    %93 = vector.extract_strided_slice %91 {offsets = [0, 0], sizes = [4, 64], strides = [1, 1]} : vector<8x64xf32> to vector<4x64xf32>
    %94 = tpu.concatenate %92, %93 in 0 : vector<4x64xf32>, vector<4x64xf32> -> vector<8x64xf32>
    %95 = arith.addf %91, %94 : vector<8x64xf32>
    %96 = math.exp %95 : vector<8x64xf32>
    %cst_19 = arith.constant dense<0.000000e+00> : vector<4x8xf32>
    %97 = tpu.matmul %78, %95, %cst_19 {dimension_numbers = #tpu.dot_dimension_numbers<[1], [1], [0], [0], [0, 0, 1, 0], [], []>} : vector<4x64xf32>, vector<8x64xf32>, vector<4x8xf32> -> vector<4x8xf32>
    %cst_20 = arith.constant dense<0.000000e+00> : vector<8x8xf32>
    %98 = tpu.matmul %82, %81, %cst_20 {dimension_numbers = #tpu.dot_dimension_numbers<[1], [1], [0], [0], [0, 0, 1, 0], [], []>} : vector<8x16xf32>, vector<8x16xf32>, vector<8x8xf32> -> vector<8x8xf32>
    %99 = vector.extract_strided_slice %95 {offsets = [0, 0], sizes = [8, 1], strides = [1, 1]} : vector<8x64xf32> to vector<8x1xf32>
    %100 = vector.extract_strided_slice %97 {offsets = [0, 0], sizes = [1, 8], strides = [1, 1]} : vector<4x8xf32> to vector<1x8xf32>
    %101 = vector.broadcast %99 : vector<8x1xf32> to vector<8x8xf32>
    %102 = vector.broadcast %100 : vector<1x8xf32> to vector<8x8xf32>
    %103 = arith.subf %101, %102 : vector<8x8xf32>
    %cst_21 = arith.constant -1.000000e+30 : f32
    %104 = vector.broadcast %cst_21 : f32 to vector<8x8xf32>
    %105 = arith.select %71, %103, %104 : vector<8x8xi1>, vector<8x8xf32>
    %106 = math.exp %105 : vector<8x8xf32>
    %107 = arith.mulf %98, %106 : vector<8x8xf32>
    %108 = vector.extract_strided_slice %83 {offsets = [0, 0], sizes = [8, 16], strides = [1, 1]} : vector<8x64xf32> to vector<8x16xf32>
    %cst_22 = arith.constant dense<0.000000e+00> : vector<8x16xf32>
    %109 = tpu.matmul %107, %108, %cst_22 {dimension_numbers = #tpu.dot_dimension_numbers<[1], [0], [0], [1], [0, 0, 1, 1], [], []>} : vector<8x8xf32>, vector<8x16xf32>, vector<8x16xf32> -> vector<8x16xf32>
    %110 = vector.extract_strided_slice %95 {offsets = [0, 16], sizes = [8, 1], strides = [1, 1]} : vector<8x64xf32> to vector<8x1xf32>
    %111 = vector.extract_strided_slice %97 {offsets = [1, 0], sizes = [1, 8], strides = [1, 1]} : vector<4x8xf32> to vector<1x8xf32>
    %112 = vector.broadcast %110 : vector<8x1xf32> to vector<8x8xf32>
    %113 = vector.broadcast %111 : vector<1x8xf32> to vector<8x8xf32>
    %114 = arith.subf %112, %113 : vector<8x8xf32>
    %cst_23 = arith.constant -1.000000e+30 : f32
    %115 = vector.broadcast %cst_23 : f32 to vector<8x8xf32>
    %116 = arith.select %71, %114, %115 : vector<8x8xi1>, vector<8x8xf32>
    %117 = math.exp %116 : vector<8x8xf32>
    %118 = arith.mulf %98, %117 : vector<8x8xf32>
    %119 = vector.extract_strided_slice %83 {offsets = [0, 16], sizes = [8, 16], strides = [1, 1]} : vector<8x64xf32> to vector<8x16xf32>
    %cst_24 = arith.constant dense<0.000000e+00> : vector<8x16xf32>
    %120 = tpu.matmul %118, %119, %cst_24 {dimension_numbers = #tpu.dot_dimension_numbers<[1], [0], [0], [1], [0, 0, 1, 1], [], []>} : vector<8x8xf32>, vector<8x16xf32>, vector<8x16xf32> -> vector<8x16xf32>
    %121 = vector.extract_strided_slice %95 {offsets = [0, 32], sizes = [8, 1], strides = [1, 1]} : vector<8x64xf32> to vector<8x1xf32>
    %122 = vector.extract_strided_slice %97 {offsets = [2, 0], sizes = [1, 8], strides = [1, 1]} : vector<4x8xf32> to vector<1x8xf32>
    %123 = vector.broadcast %121 : vector<8x1xf32> to vector<8x8xf32>
    %124 = vector.broadcast %122 : vector<1x8xf32> to vector<8x8xf32>
    %125 = arith.subf %123, %124 : vector<8x8xf32>
    %cst_25 = arith.constant -1.000000e+30 : f32
    %126 = vector.broadcast %cst_25 : f32 to vector<8x8xf32>
    %127 = arith.select %71, %125, %126 : vector<8x8xi1>, vector<8x8xf32>
    %128 = math.exp %127 : vector<8x8xf32>
    %129 = arith.mulf %98, %128 : vector<8x8xf32>
    %130 = vector.extract_strided_slice %83 {offsets = [0, 32], sizes = [8, 16], strides = [1, 1]} : vector<8x64xf32> to vector<8x16xf32>
    %cst_26 = arith.constant dense<0.000000e+00> : vector<8x16xf32>
    %131 = tpu.matmul %129, %130, %cst_26 {dimension_numbers = #tpu.dot_dimension_numbers<[1], [0], [0], [1], [0, 0, 1, 1], [], []>} : vector<8x8xf32>, vector<8x16xf32>, vector<8x16xf32> -> vector<8x16xf32>
    %132 = vector.extract_strided_slice %95 {offsets = [0, 48], sizes = [8, 1], strides = [1, 1]} : vector<8x64xf32> to vector<8x1xf32>
    %133 = vector.extract_strided_slice %97 {offsets = [3, 0], sizes = [1, 8], strides = [1, 1]} : vector<4x8xf32> to vector<1x8xf32>
    %134 = vector.broadcast %132 : vector<8x1xf32> to vector<8x8xf32>
    %135 = vector.broadcast %133 : vector<1x8xf32> to vector<8x8xf32>
    %136 = arith.subf %134, %135 : vector<8x8xf32>
    %cst_27 = arith.constant -1.000000e+30 : f32
    %137 = vector.broadcast %cst_27 : f32 to vector<8x8xf32>
    %138 = arith.select %71, %136, %137 : vector<8x8xi1>, vector<8x8xf32>
    %139 = math.exp %138 : vector<8x8xf32>
    %140 = arith.mulf %98, %139 : vector<8x8xf32>
    %141 = vector.extract_strided_slice %83 {offsets = [0, 48], sizes = [8, 16], strides = [1, 1]} : vector<8x64xf32> to vector<8x16xf32>
    %cst_28 = arith.constant dense<0.000000e+00> : vector<8x16xf32>
    %142 = tpu.matmul %140, %141, %cst_28 {dimension_numbers = #tpu.dot_dimension_numbers<[1], [0], [0], [1], [0, 0, 1, 1], [], []>} : vector<8x8xf32>, vector<8x16xf32>, vector<8x16xf32> -> vector<8x16xf32>
    %143 = tpu.concatenate %109, %120, %131, %142 in 1 : vector<8x16xf32>, vector<8x16xf32>, vector<8x16xf32>, vector<8x16xf32> -> vector<8x64xf32>
    %cst_29 = arith.constant dense<0.000000e+00> : vector<8x64xf32>
    %144 = tpu.matmul %82, %79, %cst_29 {dimension_numbers = #tpu.dot_dimension_numbers<[1], [0], [0], [1], [0, 0, 1, 1], [], []>} : vector<8x16xf32>, vector<16x64xf32>, vector<8x64xf32> -> vector<8x64xf32>
    %145 = arith.mulf %96, %144 : vector<8x64xf32>
    %146 = arith.addf %143, %145 : vector<8x64xf32>
    %147 = vector.extract_strided_slice %96 {offsets = [7, 0], sizes = [1, 64], strides = [1, 1]} : vector<8x64xf32> to vector<1x64xf32>
    %148 = vector.extract_strided_slice %95 {offsets = [7, 0], sizes = [1, 64], strides = [1, 1]} : vector<8x64xf32> to vector<1x64xf32>
    %149 = vector.broadcast %148 : vector<1x64xf32> to vector<8x64xf32>
    %150 = arith.subf %149, %95 : vector<8x64xf32>
    %151 = math.exp %150 : vector<8x64xf32>
    %152 = vector.broadcast %147 : vector<1x64xf32> to vector<16x64xf32>
    %153 = arith.mulf %79, %152 : vector<16x64xf32>
    %154 = arith.mulf %83, %151 : vector<8x64xf32>
    %cst_30 = arith.constant dense<0.000000e+00> : vector<16x64xf32>
    %155 = tpu.matmul %81, %154, %cst_30 {dimension_numbers = #tpu.dot_dimension_numbers<[0], [0], [1], [1], [0, 1, 1, 1], [], []>} : vector<8x16xf32>, vector<8x64xf32>, vector<16x64xf32> -> vector<16x64xf32>
    %156 = arith.addf %153, %155 : vector<16x64xf32>
    %157 = vector.extract_strided_slice %67 {offsets = [8, 0], sizes = [8, 64], strides = [1, 1]} : vector<16x64xf32> to vector<8x64xf32>
    %158 = vector.extract_strided_slice %48 {offsets = [8, 0], sizes = [8, 16], strides = [1, 1]} : vector<16x16xf32> to vector<8x16xf32>
    %159 = vector.extract_strided_slice %49 {offsets = [8, 0], sizes = [8, 16], strides = [1, 1]} : vector<16x16xf32> to vector<8x16xf32>
    %160 = vector.extract_strided_slice %68 {offsets = [8, 0], sizes = [8, 64], strides = [1, 1]} : vector<16x64xf32> to vector<8x64xf32>
    %cst_31 = arith.constant 0.000000e+00 : f32
    %161 = vector.broadcast %cst_31 : f32 to vector<1x64xf32>
    %162 = vector.extract_strided_slice %157 {offsets = [0, 0], sizes = [7, 64], strides = [1, 1]} : vector<8x64xf32> to vector<7x64xf32>
    %163 = tpu.concatenate %161, %162 in 0 : vector<1x64xf32>, vector<7x64xf32> -> vector<8x64xf32>
    %164 = arith.addf %157, %163 : vector<8x64xf32>
    %cst_32 = arith.constant 0.000000e+00 : f32
    %165 = vector.broadcast %cst_32 : f32 to vector<2x64xf32>
    %166 = vector.extract_strided_slice %164 {offsets = [0, 0], sizes = [6, 64], strides = [1, 1]} : vector<8x64xf32> to vector<6x64xf32>
    %167 = tpu.concatenate %165, %166 in 0 : vector<2x64xf32>, vector<6x64xf32> -> vector<8x64xf32>
    %168 = arith.addf %164, %167 : vector<8x64xf32>
    %cst_33 = arith.constant 0.000000e+00 : f32
    %169 = vector.broadcast %cst_33 : f32 to vector<4x64xf32>
    %170 = vector.extract_strided_slice %168 {offsets = [0, 0], sizes = [4, 64], strides = [1, 1]} : vector<8x64xf32> to vector<4x64xf32>
    %171 = tpu.concatenate %169, %170 in 0 : vector<4x64xf32>, vector<4x64xf32> -> vector<8x64xf32>
    %172 = arith.addf %168, %171 : vector<8x64xf32>
    %173 = math.exp %172 : vector<8x64xf32>
    %cst_34 = arith.constant dense<0.000000e+00> : vector<4x8xf32>
    %174 = tpu.matmul %78, %172, %cst_34 {dimension_numbers = #tpu.dot_dimension_numbers<[1], [1], [0], [0], [0, 0, 1, 0], [], []>} : vector<4x64xf32>, vector<8x64xf32>, vector<4x8xf32> -> vector<4x8xf32>
    %cst_35 = arith.constant dense<0.000000e+00> : vector<8x8xf32>
    %175 = tpu.matmul %159, %158, %cst_35 {dimension_numbers = #tpu.dot_dimension_numbers<[1], [1], [0], [0], [0, 0, 1, 0], [], []>} : vector<8x16xf32>, vector<8x16xf32>, vector<8x8xf32> -> vector<8x8xf32>
    %176 = vector.extract_strided_slice %172 {offsets = [0, 0], sizes = [8, 1], strides = [1, 1]} : vector<8x64xf32> to vector<8x1xf32>
    %177 = vector.extract_strided_slice %174 {offsets = [0, 0], sizes = [1, 8], strides = [1, 1]} : vector<4x8xf32> to vector<1x8xf32>
    %178 = vector.broadcast %176 : vector<8x1xf32> to vector<8x8xf32>
    %179 = vector.broadcast %177 : vector<1x8xf32> to vector<8x8xf32>
    %180 = arith.subf %178, %179 : vector<8x8xf32>
    %cst_36 = arith.constant -1.000000e+30 : f32
    %181 = vector.broadcast %cst_36 : f32 to vector<8x8xf32>
    %182 = arith.select %71, %180, %181 : vector<8x8xi1>, vector<8x8xf32>
    %183 = math.exp %182 : vector<8x8xf32>
    %184 = arith.mulf %175, %183 : vector<8x8xf32>
    %185 = vector.extract_strided_slice %160 {offsets = [0, 0], sizes = [8, 16], strides = [1, 1]} : vector<8x64xf32> to vector<8x16xf32>
    %cst_37 = arith.constant dense<0.000000e+00> : vector<8x16xf32>
    %186 = tpu.matmul %184, %185, %cst_37 {dimension_numbers = #tpu.dot_dimension_numbers<[1], [0], [0], [1], [0, 0, 1, 1], [], []>} : vector<8x8xf32>, vector<8x16xf32>, vector<8x16xf32> -> vector<8x16xf32>
    %187 = vector.extract_strided_slice %172 {offsets = [0, 16], sizes = [8, 1], strides = [1, 1]} : vector<8x64xf32> to vector<8x1xf32>
    %188 = vector.extract_strided_slice %174 {offsets = [1, 0], sizes = [1, 8], strides = [1, 1]} : vector<4x8xf32> to vector<1x8xf32>
    %189 = vector.broadcast %187 : vector<8x1xf32> to vector<8x8xf32>
    %190 = vector.broadcast %188 : vector<1x8xf32> to vector<8x8xf32>
    %191 = arith.subf %189, %190 : vector<8x8xf32>
    %cst_38 = arith.constant -1.000000e+30 : f32
    %192 = vector.broadcast %cst_38 : f32 to vector<8x8xf32>
    %193 = arith.select %71, %191, %192 : vector<8x8xi1>, vector<8x8xf32>
    %194 = math.exp %193 : vector<8x8xf32>
    %195 = arith.mulf %175, %194 : vector<8x8xf32>
    %196 = vector.extract_strided_slice %160 {offsets = [0, 16], sizes = [8, 16], strides = [1, 1]} : vector<8x64xf32> to vector<8x16xf32>
    %cst_39 = arith.constant dense<0.000000e+00> : vector<8x16xf32>
    %197 = tpu.matmul %195, %196, %cst_39 {dimension_numbers = #tpu.dot_dimension_numbers<[1], [0], [0], [1], [0, 0, 1, 1], [], []>} : vector<8x8xf32>, vector<8x16xf32>, vector<8x16xf32> -> vector<8x16xf32>
    %198 = vector.extract_strided_slice %172 {offsets = [0, 32], sizes = [8, 1], strides = [1, 1]} : vector<8x64xf32> to vector<8x1xf32>
    %199 = vector.extract_strided_slice %174 {offsets = [2, 0], sizes = [1, 8], strides = [1, 1]} : vector<4x8xf32> to vector<1x8xf32>
    %200 = vector.broadcast %198 : vector<8x1xf32> to vector<8x8xf32>
    %201 = vector.broadcast %199 : vector<1x8xf32> to vector<8x8xf32>
    %202 = arith.subf %200, %201 : vector<8x8xf32>
    %cst_40 = arith.constant -1.000000e+30 : f32
    %203 = vector.broadcast %cst_40 : f32 to vector<8x8xf32>
    %204 = arith.select %71, %202, %203 : vector<8x8xi1>, vector<8x8xf32>
    %205 = math.exp %204 : vector<8x8xf32>
    %206 = arith.mulf %175, %205 : vector<8x8xf32>
    %207 = vector.extract_strided_slice %160 {offsets = [0, 32], sizes = [8, 16], strides = [1, 1]} : vector<8x64xf32> to vector<8x16xf32>
    %cst_41 = arith.constant dense<0.000000e+00> : vector<8x16xf32>
    %208 = tpu.matmul %206, %207, %cst_41 {dimension_numbers = #tpu.dot_dimension_numbers<[1], [0], [0], [1], [0, 0, 1, 1], [], []>} : vector<8x8xf32>, vector<8x16xf32>, vector<8x16xf32> -> vector<8x16xf32>
    %209 = vector.extract_strided_slice %172 {offsets = [0, 48], sizes = [8, 1], strides = [1, 1]} : vector<8x64xf32> to vector<8x1xf32>
    %210 = vector.extract_strided_slice %174 {offsets = [3, 0], sizes = [1, 8], strides = [1, 1]} : vector<4x8xf32> to vector<1x8xf32>
    %211 = vector.broadcast %209 : vector<8x1xf32> to vector<8x8xf32>
    %212 = vector.broadcast %210 : vector<1x8xf32> to vector<8x8xf32>
    %213 = arith.subf %211, %212 : vector<8x8xf32>
    %cst_42 = arith.constant -1.000000e+30 : f32
    %214 = vector.broadcast %cst_42 : f32 to vector<8x8xf32>
    %215 = arith.select %71, %213, %214 : vector<8x8xi1>, vector<8x8xf32>
    %216 = math.exp %215 : vector<8x8xf32>
    %217 = arith.mulf %175, %216 : vector<8x8xf32>
    %218 = vector.extract_strided_slice %160 {offsets = [0, 48], sizes = [8, 16], strides = [1, 1]} : vector<8x64xf32> to vector<8x16xf32>
    %cst_43 = arith.constant dense<0.000000e+00> : vector<8x16xf32>
    %219 = tpu.matmul %217, %218, %cst_43 {dimension_numbers = #tpu.dot_dimension_numbers<[1], [0], [0], [1], [0, 0, 1, 1], [], []>} : vector<8x8xf32>, vector<8x16xf32>, vector<8x16xf32> -> vector<8x16xf32>
    %220 = tpu.concatenate %186, %197, %208, %219 in 1 : vector<8x16xf32>, vector<8x16xf32>, vector<8x16xf32>, vector<8x16xf32> -> vector<8x64xf32>
    %cst_44 = arith.constant dense<0.000000e+00> : vector<8x64xf32>
    %221 = tpu.matmul %159, %156, %cst_44 {dimension_numbers = #tpu.dot_dimension_numbers<[1], [0], [0], [1], [0, 0, 1, 1], [], []>} : vector<8x16xf32>, vector<16x64xf32>, vector<8x64xf32> -> vector<8x64xf32>
    %222 = arith.mulf %173, %221 : vector<8x64xf32>
    %223 = arith.addf %220, %222 : vector<8x64xf32>
    %224 = vector.extract_strided_slice %173 {offsets = [7, 0], sizes = [1, 64], strides = [1, 1]} : vector<8x64xf32> to vector<1x64xf32>
    %225 = vector.extract_strided_slice %172 {offsets = [7, 0], sizes = [1, 64], strides = [1, 1]} : vector<8x64xf32> to vector<1x64xf32>
    %226 = vector.broadcast %225 : vector<1x64xf32> to vector<8x64xf32>
    %227 = arith.subf %226, %172 : vector<8x64xf32>
    %228 = math.exp %227 : vector<8x64xf32>
    %229 = vector.broadcast %224 : vector<1x64xf32> to vector<16x64xf32>
    %230 = arith.mulf %156, %229 : vector<16x64xf32>
    %231 = arith.mulf %160, %228 : vector<8x64xf32>
    %cst_45 = arith.constant dense<0.000000e+00> : vector<16x64xf32>
    %232 = tpu.matmul %158, %231, %cst_45 {dimension_numbers = #tpu.dot_dimension_numbers<[0], [0], [1], [1], [0, 1, 1, 1], [], []>} : vector<8x16xf32>, vector<8x64xf32>, vector<16x64xf32> -> vector<16x64xf32>
    %233 = arith.addf %230, %232 : vector<16x64xf32>
    %c0_46 = arith.constant 0 : index
    %c0_47 = arith.constant 0 : index
    %234 = vector.load %arg7[%c0_46, %c0_47] : memref<16x64xf32, #tpu.memory_space<vmem>>, vector<16x64xf32>
    tpu.vector_store %arg7[%c0_46, %c0_47], %233 {strides = array<i32>} : memref<16x64xf32, #tpu.memory_space<vmem>>, vector<16x64xf32>,
    %235 = tpu.concatenate %146, %223 in 0 : vector<8x64xf32>, vector<8x64xf32> -> vector<16x64xf32>
    %236 = vector.broadcast %8 : vector<1x64xf32> to vector<16x64xf32>
    %237 = arith.mulf %47, %236 : vector<16x64xf32>
    %238 = arith.addf %235, %237 : vector<16x64xf32>
    %239 = arith.negf %13 : vector<16x64xf32>
    %240 = math.exp %239 : vector<16x64xf32>
    %cst_48 = arith.constant 1.000000e+00 : f32
    %241 = vector.broadcast %cst_48 : f32 to vector<16x64xf32>
    %242 = arith.addf %241, %240 : vector<16x64xf32>
    %243 = arith.divf %241, %242 : vector<16x64xf32>
    %244 = arith.mulf %13, %243 : vector<16x64xf32>
    %245 = arith.mulf %238, %244 : vector<16x64xf32>
    %c0_49 = arith.constant 0 : index
    %c0_50 = arith.constant 0 : index
    %246 = vector.load %arg5[%c0_49, %c0_50] : memref<32x64xf32, #tpu.memory_space<vmem>>, vector<32x64xf32>
    %cst_51 = arith.constant dense<0.000000e+00> : vector<32x16xf32>
    %247 = tpu.matmul %246, %245, %cst_51 {dimension_numbers = #tpu.dot_dimension_numbers<[1], [1], [0], [0], [0, 0, 1, 0], [], []>} : vector<32x64xf32>, vector<16x64xf32>, vector<32x16xf32> -> vector<32x16xf32>
    %c0_52 = arith.constant 0 : index
    %c0_53 = arith.constant 0 : index
    %c0_54 = arith.constant 0 : index
    %248 = vector.load %arg6[%c0_52, %c0_53, %c0_54] : memref<1x32x16xf32, #tpu.memory_space<vmem>>, vector<1x32x16xf32>
    %249 = vector.shape_cast %248 : vector<1x32x16xf32> to vector<32x16xf32>
    %250 = vector.shape_cast %247 : vector<32x16xf32> to vector<1x32x16xf32>
    tpu.vector_store %arg6[%c0_52, %c0_53, %c0_54], %250 {strides = array<i32>} : memref<1x32x16xf32, #tpu.memory_space<vmem>>, vector<1x32x16xf32>,
    return
  }
  func.func @transform_0(%arg0: i32, %arg1: i32) -> (i32, i32, i32) {
    %c0_i32 = arith.constant 0 : i32
    %c0_i32_0 = arith.constant 0 : i32
    return %arg0, %arg1, %c0_i32 : i32, i32, i32
  }
  func.func @transform_1(%arg0: i32, %arg1: i32) -> (i32, i32) {
    %c0_i32 = arith.constant 0 : i32
    %c0_i32_0 = arith.constant 0 : i32
    %c0_i32_1 = arith.constant 0 : i32
    return %c0_i32, %c0_i32_0 : i32, i32
  }
  func.func @transform_2(%arg0: i32, %arg1: i32) -> (i32, i32) {
    %c0_i32 = arith.constant 0 : i32
    %c0_i32_0 = arith.constant 0 : i32
    %c0_i32_1 = arith.constant 0 : i32
    return %c0_i32, %c0_i32_0 : i32, i32
  }
  func.func @transform_3(%arg0: i32, %arg1: i32) -> (i32, i32) {
    %c0_i32 = arith.constant 0 : i32
    %c0_i32_0 = arith.constant 0 : i32
    %c0_i32_1 = arith.constant 0 : i32
    return %c0_i32, %c0_i32_0 : i32, i32
  }
  func.func @transform_4(%arg0: i32, %arg1: i32) -> (i32, i32, i32) {
    %c0_i32 = arith.constant 0 : i32
    %c0_i32_0 = arith.constant 0 : i32
    return %arg0, %c0_i32, %arg1 : i32, i32, i32
  }
}

</mosaic_0001>

<bundles_post_ra>
// kernel: tpu_custom_call.1
= control target key start
LH: loop header
LB: loop body
LE: loop exit
PB: predicated region body
PF: predicated region fallthrough
CT: control target
= control target key end

     0   :  { %9 = vsyncpa [#allocation5], 0  ;;  %s3534_s0 = inlined_call_operand.hbm [shape: f32[2,16,32], index: 0, kind: input, shape index: {}]   ;;  %s3535_s1 = inlined_call_operand.hbm [shape: f32[32,384], index: 1, kind: input, shape index: {}]   ;;  %s3536_s2 = inlined_call_operand.hbm [shape: f32[8,128], index: 2, kind: input, shape index: {}]   ;;  %s3537_s3 = inlined_call_operand.hbm [shape: f32[32,64], index: 3, kind: input, shape index: {}]   ;;  %s3538_s4 = inlined_call_operand.vmem [shape: f32[2,32,16], index: 4, kind: output, shape index: {}]  }
   0x1   :  { %11 = vsyncpa [#allocation5 + $0x1], 0 }
   0x2   :  { %12 = vsyncpa [#allocation7], 0 }
   0x3   :  { %13 = vsyncpa [#allocation10], 0  ;;  %s2997_s15 = smov 0   ;;  %s2999_s16 = smov 0  }
   0x4   :  { %s3001_s17 = smov 0   ;;  %s3003_s18 = smov 0  }
   0x5   :  { %s3005_s19 = smov 0   ;;  %s3007_s20 = smov 0  }
   0x6 LB: > { %s2376_s21 = sadd.s32 4294967295, %s2948_s20   ;;  %p53_p0 = scmp.ne.s32.totalorder %s2932_s16, %s2928_s15  ;;  %s2948_s20 = sphi %s3007_s20, %s19_s20   ;;  %s2944_s19 = sphi %s3005_s19, %s3558_s19   ;;  %s2940_s18 = sphi %s3003_s18, %s3557_s18   ;;  %s2936_s17 = sphi %s3001_s17, %s3556_s17   ;;  %s2932_s16 = sphi %s2999_s16, %s3555_s16   ;;  %s2928_s15 = sphi %s2997_s15, %s3554_s15  }
   0x7   : > { %p3027_p1 = scmp.eq.s32.totalorder %s2376_s21, 0  ;;  %p2378_p2 = scmp.ge.s32.totalorder %s2948_s20, 1 }
   0x8   : > { %p155_p3 = scmp.lt.s32.totalorder %s2948_s20, 3  ;;  %s2950_s25 = smov [#allocation6]  }
   0x9   : > { %s3543_s22 = scalar_select %p3027_p1, 1, 0 }
   0xa   : > { %p3035_p4 = por %p3027_p1, %p53_p0  ;;  %p3039_p5 = pnand %p2378_p2, %p155_p3 }
   0xb   : > { %s167_s26 = sshll.u32 %s2950_s25, 4  ;;  %s2951_s28 = smov [#allocation8]   ;;  %s3043_s26 = int_to_ptr.vmem [resolvable:$true] %s167_s26 }
   0xc   : > { %s3544_s23 = scalar_select %p3035_p4, 1, 0 }
   0xd   : > { %s3545_s24 = scalar_select %p3039_p5, 1, 0 }
   0xe   : > { %p2629_p6 = pneg %p3039_p5  ;;  %s181_s29 = sshll.u32 %s2951_s28, 4  ;;  %s3053_s29 = int_to_ptr.vmem [resolvable:$true] %s181_s29 }
   0xf   : > { %s2952_s30 = smov [#allocation9]   ;;  %s2776_s8 = scalar_lea.hbm %s3535_s1, 1536 }
  0x10   : > { %p3049_p7 = pnand %p2629_p6, %p3027_p1  ;;  %s3055_s5 = sshll.u32 %s2952_s30, 4  ;;  %s192_s5 = int_to_ptr.vmem [resolvable:$true] %s3055_s5 }
  0x11   : > { %p2777_p8 = scmp.ne.s32.totalorder %s3535_s1, %s2776_s8  ;;  %p2783_p12 = scmp.lt.u32.totalorder %s2776_s8, %s3535_s1 }
  0x12   : > { %p3065_p9 = pneg %p3049_p7 }
  0x14   : > { %p2779_p10 = pnand %p3065_p9, %p2777_p8 }
  0x16   : > { %p2780_p11 = pneg %p2779_p10 }
  0x18   : > { %p2785_p13 = pnand %p2783_p12, %p2780_p11 }
  0x1a   : > { %2788 = shalt.err (!%p2785_p13)
}
  0x1b   : > { %s2789_s14 = scalar_lea.vmem %s3043_s26, 1536  ;;  %p2797_p6 = scmp.lt.s32.totalorder %s3043_s26, %s3043_s26 }
  0x1c   : > { %p2790_p0 = scmp.ne.s32.totalorder %s3043_s26, %s2789_s14  ;;  %p2798_p1 = scmp.lt.s32.totalorder %s2789_s14, %s2789_s14 }
  0x1e   : > { %p2792_p2 = pnand %p2790_p0, %p3065_p9  ;;  %p2799_p8 = por %p2798_p1, %p2797_p6 }
  0x20   : > { %p2793_p3 = pneg %p2792_p2 }
  0x22   : > { %p2800_p10 = pnand %p2799_p8, %p2793_p3 }
  0x24   : > { %2803 = shalt.err (!%p2800_p10)
}
  0x25   : > { %s2953_s15 = smov 384   ;;  %s2954_s21 = smov 24  }
  0x26   : > { %2632 = dma.hbm_to_vmem [thread:$0]  (!%p3049_p7), %s3535_s1, 1536, %s3043_s26, [#allocation7], %s2953_s15, %s2953_s15, %s2954_s21  }
  0x27   : > { %s2804_s7 = scalar_lea.hbm %s3536_s2, 128 }
  0x28   : > { %p2805_p1 = scmp.ne.s32.totalorder %s3536_s2, %s2804_s7  ;;  %p2811_p13 = scmp.lt.u32.totalorder %s2804_s7, %s3536_s2 }
  0x2a   : > { %p2807_p11 = pnand %p2805_p1, %p3065_p9 }
  0x2c   : > { %p2808_p12 = pneg %p2807_p11 }
  0x2e   : > { %p2813_p0 = pnand %p2811_p13, %p2808_p12 }
  0x30   : > { %2816 = shalt.err (!%p2813_p0)
}
  0x31   : > { %s2817_s26 = scalar_lea.vmem %s3053_s29, 128  ;;  %p2825_p8 = scmp.lt.s32.totalorder %s3053_s29, %s3053_s29 }
  0x32   : > { %p2818_p2 = scmp.ne.s32.totalorder %s3053_s29, %s2817_s26  ;;  %p2826_p10 = scmp.lt.s32.totalorder %s2817_s26, %s2817_s26 }
  0x34   : > { %p2820_p3 = pnand %p2818_p2, %p3065_p9  ;;  %p2827_p1 = por %p2826_p10, %p2825_p8 }
  0x36   : > { %p2821_p6 = pneg %p2820_p3 }
  0x38   : > { %p2828_p11 = pnand %p2827_p1, %p2821_p6 }
  0x3a   : > { %2831 = shalt.err (!%p2828_p11)
}
  0x3b   : > { %2635 = dma.hbm_to_vmem [thread:$0]  (!%p3049_p7), %s3536_s2, 128, %s3053_s29, [#allocation7]  }
  0x3c   : > { %s2832_s25 = scalar_lea.hbm %s3537_s3, 512 }
  0x3d   : > { %p2833_p12 = scmp.ne.s32.totalorder %s3537_s3, %s2832_s25  ;;  %p2839_p2 = scmp.lt.u32.totalorder %s2832_s25, %s3537_s3 }
  0x3f   : > { %p2835_p13 = pnand %p2833_p12, %p3065_p9 }
  0x41   : > { %p2836_p0 = pneg %p2835_p13 }
  0x43   : > { %p2841_p3 = pnand %p2839_p2, %p2836_p0 }
  0x45   : > { %2844 = shalt.err (!%p2841_p3)
}
  0x46   : > { %s2845_s8 = scalar_lea.vmem %s192_s5, 512  ;;  %p2853_p1 = scmp.lt.s32.totalorder %s192_s5, %s192_s5 }
  0x47   : > { %p2846_p6 = scmp.ne.s32.totalorder %s192_s5, %s2845_s8  ;;  %p2854_p11 = scmp.lt.s32.totalorder %s2845_s8, %s2845_s8 }
  0x49   : > { %p2848_p8 = pnand %p2846_p6, %p3065_p9  ;;  %p2855_p4 = por %p2854_p11, %p2853_p1 }
  0x4b   : > { %p2849_p10 = pneg %p2848_p8 }
  0x4d   : > { %p2856_p5 = pnand %p2855_p4, %p2849_p10 }
  0x4f   : > { %2859 = shalt.err (!%p2856_p5)
}
  0x50   : > { %s2955_s29 = smov 128   ;;  %s2956_s9 = smov 8  }
  0x51   : > { %2638 = dma.hbm_to_vmem [thread:$0]  (!%p3049_p7), %s3537_s3, 512, %s192_s5, [#allocation10], %s2955_s29, %s2955_s29, %s2956_s9  }
  0x52   : > { %s31_s12 = sadd.s32 1, %s2944_s19  ;;  %p47_p4 = scmp.ne.s32.totalorder %s2936_s17, %s2932_s16 }
  0x53   : > { %p33_p5 = scmp.ge.s32.totalorder %s31_s12, 2  ;;  %p48_p9 = scmp.eq.s32.totalorder %s2948_s20, 0 }
  0x54   : > { %s40_s26 = sadd.s32 1, %s2936_s17  ;;  %s205_s13 = sand.u32 1, %s2936_s17  }
  0x55   : > { %s3560_s12 = smov (%p33_p5, %s31_s12), 0  ;;  %p49_p12 = por %p48_p9, %p47_p4 }
  0x56   : > { %p2646_p13 = scmp.lt.s32.totalorder %s2948_s20, 2  ;;  %s35_s27 = ssub.s32 %s2944_s19, %s3560_s12 }
  0x57   : > { %s2383_s14 = sshll.u32 %s205_s13, 4  ;;  %p38_p0 = scmp.eq.s32.totalorder %s35_s27, 0 }
  0x58   : > { %s2432_s15 = sshll.u32 %s2944_s19, 8  ;;  %s209_s21 = scalar_lea.vmem [#allocation4], %s2383_s14 }
  0x59   : > { %s218_s25 = sshll.u32 %s209_s21, 4  ;;  %s3149_s6 = scalar_lea.hbm %s3534_s0, %s2432_s15  ;;  %s3151_s25 = int_to_ptr.vmem [resolvable:$true] %s218_s25 }
  0x5a   : > { %s3144_s28 = scalar_select %p38_p0, %s2936_s17, %s40_s26  }
  0x5b   : > { %p3153_p7 = pnand %p2646_p13, %p49_p12  ;;  %s3157_s8 = scalar_lea.sflag [#allocation5], %s205_s13 }
  0x5c   : > { %s2860_s11 = scalar_lea.hbm %s3149_s6, 256  ;;  %s2865_s27 = scalar_lea.hbm %s3534_s0, 512 }
  0x5d   : > { %p2861_p2 = scmp.ne.s32.totalorder %s3149_s6, %s2860_s11  ;;  %p2862_p3 = pneg %p3153_p7 }
  0x5e   : > { %p2866_p10 = scmp.lt.u32.totalorder %s3149_s6, %s3534_s0  ;;  %p2867_p1 = scmp.lt.u32.totalorder %s2865_s27, %s2860_s11 }
  0x5f   : > { %p2863_p6 = pnand %p2862_p3, %p2861_p2  ;;  %p2869_p4 = scmp.lt.u32.totalorder %s2860_s11, %s3149_s6 }
  0x60   : > { %p2868_p11 = por %p2867_p1, %p2866_p10 }
  0x61   : > { %p2864_p8 = pneg %p2863_p6 }
  0x62   : > { %p2870_p5 = por %p2869_p4, %p2868_p11 }
  0x64   : > { %p2871_p9 = pnand %p2870_p5, %p2864_p8 }
  0x66   : > { %2874 = shalt.err (!%p2871_p9)
}
  0x67   : > { %s2875_s13 = scalar_lea.vmem %s3151_s25, 256  ;;  %s2957_s21 = smov [#allocation4]  }
  0x68   : > { %p2876_p12 = scmp.ne.s32.totalorder %s3151_s25, %s2875_s13  ;;  %s2880_s5 = sshll.u32 %s2957_s21, 4  ;;  %s2881_s5 = int_to_ptr.vmem [resolvable:$false] %s2880_s5 }
  0x69   : > { %s2882_s30 = scalar_lea.vmem %s2881_s5, 512  ;;  %p2883_p2 = scmp.lt.s32.totalorder %s3151_s25, %s2881_s5 }
  0x6a   : > { %p2878_p13 = pnand %p2876_p12, %p2862_p3  ;;  %p2884_p6 = scmp.lt.s32.totalorder %s2882_s30, %s2875_s13 }
  0x6c   : > { %p2879_p0 = pneg %p2878_p13  ;;  %p2885_p10 = por %p2884_p6, %p2883_p2 }
  0x6e   : > { %p2886_p1 = pnand %p2885_p10, %p2879_p0 }
  0x70   : > { %2889 = shalt.err (!%p2886_p1)
}
  0x71   : > { %2642 = dma.hbm_to_vmem [thread:$0]  (!%p3153_p7), %s3149_s6, 256, %s3151_s25, %s3157_s8, %s2955_s29, %s2955_s29, %s2956_s9  }
  0x72   : > { %p3549_p3 = scmp.ne.s32.totalorder %s3545_s24, 0 }
  0x73   : > { %s232_s11 = sand.u32 (!%p3549_p3), 1, %s2932_s16   ;;  %p3550_p8 = scmp.ne.s32.totalorder (!%p3549_p3), %s3544_s23, 0 }
  0x74   : > { %230 = sbr.rel (%p3549_p3) target bundleno = 1593 (0x639), region = 36  ;;  %s3191_s10 = sshll.u32 (!%p3549_p3), %s232_s11, 4 }
  0x75   : > { %s233_s26 = scalar_lea.sflag (!%p3549_p3), [#allocation5], %s232_s11  ;;  %s236_s27 = scalar_lea.vmem (!%p3549_p3), [#allocation4], %s3191_s10 }
  0x7b   : > { %2915 = dma.done.wait (%p3550_p8), %s233_s26, 256  }
  0x7c   : > { %2917 = vsyncadd (%p3550_p8), %s233_s26, 4294967040  ;;  %p3551_p11 = scmp.ne.s32.totalorder %s3543_s22, 0 }
  0x7e   : > { %2919 = dma.done.wait (%p3551_p11), [#allocation7], 1664  }
  0x7f   : > { %2921 = vsyncadd (%p3551_p11), [#allocation7], 4294965632 }
  0x80   : > { %2923 = dma.done.wait (%p3551_p11), [#allocation10], 512  }
  0x81   : > { %2925 = vsyncadd (%p3551_p11), [#allocation10], 4294966784  ;;  %v2958_v0 = vmov 0.0   ;;  %v298_v1 = vld [vmem:[#allocation6 + $0x8] sm:$0xff]  ;;  %v301_v2 = vld [vmem:[#allocation6 + $0x20] sm:$0xff]  ;;  %vm309_vm0 = vcmask 261120   ;;  %v481_v23 = vlaneseq }
  0x82   : > { %380 = vmatprep.mubr.f32.mxu0 %v2958_v0  ;;  %2493 = vmatprep.subr.mxu1 %v2958_v0  ;;  %v297_v3 = vld [vmem:[#allocation6] sm:$0xff]  ;;  %v2587_v4 = vpack.c.bf16 %v301_v2, %v298_v1  ;;  %v300_v5 = vld [vmem:[#allocation6 + $0x18] sm:$0xff]  ;;  %v307_v7 = vld [vmem:[#allocation6 + $0x50] sm:$0xff]  ;;  %vm292_vm1 = vcmask 780288   ;;  %v2959_v21 = vmov 16   ;;  %v2960_v22 = vmov 0  }
  0x83   : > { %v304_v6 = vld [vmem:[#allocation6 + $0x38] sm:$0xff]  ;;  %v2589_v8 = vpack.c.bf16 %v300_v5, %v297_v3  ;;  %v303_v10 = vld [vmem:[#allocation6 + $0x30] sm:$0xff]  ;;  %v306_v11 = vld [vmem:[#allocation6 + $0x48] sm:$0xff]  ;;  %293 = vst.msk [vmem:[#allocation3] sm:$0x7] %vm292_vm1, %v2958_v0  ;;  %2721 = vset.pattern.permute.xlu0 %v2959_v21  ;;  %2719 = vset.pattern.permute.xlu1 %v2960_v22  ;;  %vm289_vm2 = vcmask 523264  }
  0x84   : > { %v2591_v9 = vpack.c.bf16 %v307_v7, %v304_v6  ;;  %2588 = vmatprep.subr.bf16.mxu0 %v2587_v4  ;;  %v299_v12 = vld [vmem:[#allocation6 + $0x10] sm:$0xff]  ;;  %v302_v13 = vld [vmem:[#allocation6 + $0x28] sm:$0xff]  ;;  %v2593_v14 = vpack.c.bf16 %v306_v11, %v303_v10  ;;  %v305_v16 = vld [vmem:[#allocation6 + $0x40] sm:$0xff]  ;;  %290 = vst.msk [vmem:[#allocation2] sm:$0xff] %vm289_vm2, %v2958_v0  ;;  %vm2961_vm3 = vmmov 0   ;;  %v3230_v24 = vshrl.u32 %v481_v23, 7 }
  0x85   : > { %2590 = vmatpush1.bf16.msra.mxu0 %v2589_v8  ;;  %v2595_v15 = vpack.c.bf16 %v302_v13, %v299_v12  ;;  %v308_v17 = vld [vmem:[#allocation6 + $0x58] sm:$0xff]  ;;  %v295_v18 = vld [vmem:[%s236_s27] sm:$0xff]  ;;  %291 = vst.msk [vmem:[#allocation2 + $0x8] sm:$0xff] %vm289_vm2, %v2958_v0  ;;  %2495 = vmatprep.mubr.msk.f32.mxu1 %vm2961_vm3, %v2958_v0  ;;  %vm471_vm4 = vcmask 1042432   ;;  %vm479_vm5 = vcmask 785413   ;;  %vm497_vm6 = vcmask 1046528  }
  0x86   : > { %2592 = vmatprep.subr.bf16.mxu0 %v2591_v9  ;;  %v2599_v19 = vpack.c.bf16 %v308_v17, %v305_v16  ;;  %v296_v20 = vld [vmem:[%s236_s27 + $0x8] sm:$0xff]  ;;  %v3233_v25 = vsub.s32 1, %v3230_v24  ;;  %v3235_v26 = vld [vmem:[#allocation8] sm:$0xff]  ;;  %v3238_v27 = vsub.s32 0, %v3230_v24  ;;  %v3243_v29 = vsub.s32 2, %v3230_v24  ;;  %s2962_s22 = smov 64  }
  0x87   : > { %v3246_v32 = vsub.s32 3, %v3230_v24  ;;  %v569_v35 = vsub.s32 5, %v3230_v24  ;;  %vm517_vm7 = vcmask 1045504   ;;  %vm537_vm8 = vcmask 1044480   ;;  %s2963_s23 = smov 48   ;;  %s2965_s24 = smov 112  }
  0x88   : > { %v490_v34 = vrot.slane %v3235_v26, %v3233_v25  ;;  %v484_v36 = vrot.slane %v3235_v26, %v3238_v27  ;;  %v510_v38 = vrot.slane %v3235_v26, %v3243_v29  ;;  %v549_v46 = vsub.s32 4, %v3230_v24  ;;  %s2967_s29 = smov 96   ;;  %s2968_s9 = smov 80  }
  0x89   : > { %2594 = vmatpush1.bf16.msra.mxu0 %v2593_v14  ;;  %v530_v40 = vrot.slane %v3235_v26, %v3246_v32  ;;  %v570_v44 = vrot.slane %v3235_v26, %v569_v35  ;;  %vm631_vm13 = vcmask 1040384   ;;  %vm637_vm14 = vcmask 1041408   ;;  %s2970_s25 = smov 16   ;;  %s2971_s6 = smov 32  }
  0x8a   : > { %2596 = vmatprep.subr.bf16.mxu0 %v2595_v15  ;;  %v468_v31 = vld [vmem:[#allocation3] sm:$0x7]  ;;  %vm643_vm15 = vcmask 1043456   ;;  %p277_p7 = scmp.lt.s32.totalorder %s2940_s18, 1 }
  0x8c   : > { %2393 = vmatmul.mubr.msk.f32.vlgmr.msra.gmra.mrb[0].mxu0 %vm309_vm0, %v295_v18  ;;  %s3562_s18 = smov (!%p277_p7, %s2940_s18), 1 }
  0x8d   : > { %2598 = vmatpush3.bf16.msra.mxu0 %v2595_v15  ;;  %386 = vmatprep.mubr.f32.mxu0 %v2958_v0  ;;  %s2433_s7 = sshll.u32 %s3562_s18, 5 }
  0x8e   : > { %2600 = vmatprep.subr.bf16.mxu0 %v2599_v19  ;;  %s284_s15 = scalar_lea.vmem %s3538_s4, %s2433_s7 }
  0x90   : > { %2394 = vmatmul.mubr.msk.f32.gmra.mrb[2].mxu0 %vm309_vm0, %v296_v20 }
  0x91   : > { %2602 = vmatpush3.bf16.msra.mxu0 %v2599_v19  ;;  %2490 = vmatprep.mubr.msk.f32.mxu0 %vm309_vm0, %v295_v18 }
  0x92   : > { %2498 = vmatprep.subr.mxu0 %v2958_v0 }
  0x94   : > { %2491 = vmatmul.mubr.msk.f32.vlgmr.msra.gmra.mrb[4].mxu0 %vm309_vm0, %v296_v20 }
  0x95   : > { %2500 = vmatprep.mubr.msk.f32.mxu0 %vm2961_vm3, %v2958_v0 }
 0x15f   : > { %v3240_v28 = vpop.f32.mrb[0].mxu0 }
 0x160   : > { %v384_v30 = vpop.f32.mrb[1].mxu0 }
 0x161   : > { %v472_v33 = vrot.slane %v384_v30, 5 }
 0x163   : > { %v478_v37 = vsel %vm471_vm4, %v468_v31, %v472_v33  ;;  %v3256_v39 = vpop.f32.mrb[2].mxu0  ;;  %v550_v31 = vrot.slane %v3235_v26, %v549_v46 }
 0x164   : > { %v390_v41 = vpop.f32.mrb[3].mxu0  ;;  %v491_v42 = vmul.f32 %v490_v34, %v478_v37  ;;  %v485_v45 = vmul.f32 %v484_v36, %v478_v37  ;;  %v511_v47 = vmul.f32 %v510_v38, %v478_v37  ;;  %v531_v52 = vmul.f32 %v530_v40, %v478_v37 }
 0x165   : > { %v473_v43 = vrot.slane %v390_v41, 5  ;;  %480 = vst.msk [vmem:[#allocation3 - $0x5] sm:$0xe0] %vm479_vm5, %v390_v41 }
 0x166   : > { %v498_v57 = vrot.slane %v491_v42, 1  ;;  %v518_v2 = vrot.slane %v511_v47, 2  ;;  %v538_v6 = vrot.slane %v531_v52, 3 }
 0x167   : > { %v474_v48 = vsel %vm471_vm4, %v472_v33, %v473_v43  ;;  %v493_v49 = vmul.f32 %v490_v34, %v473_v43  ;;  %v513_v50 = vmul.f32 %v510_v38, %v473_v43  ;;  %v2492_v51 = vpop.f32.mrb[4].mxu0  ;;  %v533_v59 = vmul.f32 %v530_v40, %v473_v43 }
 0x168   : > { %v492_v53 = vmul.f32 %v490_v34, %v474_v48  ;;  %v512_v54 = vmul.f32 %v510_v38, %v474_v48  ;;  %v532_v55 = vmul.f32 %v530_v40, %v474_v48  ;;  %v459_v56 = vpop.f32.mrb[5].mxu0  ;;  %v3263_v60 = vadd.f32 %v2492_v51, %v570_v44 }
 0x169   : > { %v501_v58 = vrot.slane %v493_v49, 1  ;;  %v3265_v1 = vadd.f32 %v570_v44, %v459_v56  ;;  %v521_v3 = vrot.slane %v513_v50, 2  ;;  %v541_v4 = vrot.slane %v533_v59, 3 }
 0x16a   : > { %v499_v61 = vrot.slane %v492_v53, 1  ;;  %v519_v62 = vrot.slane %v512_v54, 2  ;;  %v539_v63 = vrot.slane %v532_v55, 3  ;;  %v580_v5 = vand.u32 2147483647, %v3263_v60 }
 0x16b   : > { %v486_v7 = vmul.f32 %v484_v36, %v474_v48  ;;  %v579_v9 = vand.u32 2147483647, %v3265_v1  ;;  %vm575_vm11 = vcmp.ne.f32.partialorder %v3265_v1, %v3265_v1  ;;  %vm576_vm12 = vcmp.ne.f32.partialorder %v3263_v60, %v3263_v60 }
 0x16c   : > { %v502_v8 = vsel %vm497_vm6, %v499_v61, %v501_v58  ;;  %v582_v10 = vsub.f32 0.0, %v580_v5  ;;  %v500_v11 = vsel %vm497_vm6, %v498_v57, %v499_v61  ;;  %v520_v12 = vsel %vm517_vm7, %v518_v2, %v519_v62 }
 0x16d   : > { %v581_v13 = vsub.f32 0.0, %v579_v9  ;;  %v505_v14 = vadd.f32 %v500_v11, %v485_v45  ;;  %v540_v15 = vsel %vm537_vm8, %v538_v6, %v539_v63  ;;  %v506_v16 = vadd.f32 %v502_v8, %v486_v7 }
 0x16e   : > { %v585_v17 = vmul.f32 1.442695, %v582_v10  ;;  %v522_v18 = vsel %vm517_vm7, %v519_v62, %v521_v3  ;;  %v542_v19 = vsel %vm537_vm8, %v539_v63, %v541_v4  ;;  %v611_v57 = vsub.s32 6, %v3230_v24 }
 0x16f   : > { %v583_v20 = vmul.f32 1.442695, %v581_v13  ;;  %v525_v30 = vadd.f32 %v520_v12, %v505_v14  ;;  %v526_v33 = vadd.f32 %v522_v18, %v506_v16  ;;  %v573_v62 = vmax.f32 %v3265_v1, 0.0 }
 0x170   : > { %2728 = vpow2.f32 %v585_v17  ;;  %v574_v63 = vmax.f32 %v3263_v60, 0.0  ;;  %v3280_v3 = vsub.s32 7, %v3230_v24  ;;  %v612_v5 = vrot.slane %v3235_v26, %v611_v57 }
 0x171   : > { %2730 = vpow2.f32 %v583_v20  ;;  %v545_v34 = vadd.f32 %v540_v15, %v525_v30  ;;  %v546_v35 = vadd.f32 %v542_v19, %v526_v33  ;;  %vm730_vm4 = vcmask 130048  }
 0x172   : > { %v2123_v9 = vrot.slane %v3235_v26, %v3280_v3  ;;  %vm818_vm6 = vcmask 64512   ;;  %vm1174_vm7 = vcmask 392192  }
 0x173   : > { %v551_v36 = vadd.f32 %v550_v31, %v545_v34  ;;  %v552_v37 = vadd.f32 %v550_v31, %v546_v35  ;;  %v3302_v35 = vand.u32 127, %v481_v23 }
 0x175   : > { %v2397_v38 = vmul.f32 -1.442695, %v551_v36  ;;  %v2398_v40 = vmul.f32 -1.442695, %v552_v37  ;;  %vm3362_vm5 = vcmp.le.s32.totalorder %v3302_v35, %v3230_v24 }
 0x177   : > { %2732 = vpow2.f32 %v2397_v38 }
 0x178   : > { %2734 = vpow2.f32 %v2398_v40 }
 0x17a   : > { %v2729_v41 = vpop.eup %2728 }
 0x17b   : > { %v2731_v42 = vpop.eup %2730  ;;  %v596_v43 = vadd.f32 1.0, %v2729_v41  ;;  %v599_v45 = vmul.f32 -0.5, %v2729_v41  ;;  %v602_v51 = vand.u32 2147483647, %v2729_v41 }
 0x17c   : > { %v587_v44 = vadd.f32 1.0, %v2731_v42  ;;  %v590_v47 = vmul.f32 -0.5, %v2731_v42  ;;  %v593_v54 = vand.u32 2147483647, %v2731_v42 }
 0x17d   : > { %2736 = vlog2.f32 %v596_v43  ;;  %v600_v49 = vadd.f32 1.0, %v599_v45  ;;  %vm603_vm9 = vcmp.lt.f32.partialorder %v602_v51, 0.0004427343 }
 0x17e   : > { %2738 = vlog2.f32 %v587_v44  ;;  %v591_v52 = vadd.f32 1.0, %v590_v47  ;;  %vm594_vm10 = vcmp.lt.f32.partialorder %v593_v54, 0.0004427343  ;;  %v2964_v47 = vmov 32  }
 0x17f   : > { %v601_v55 = vmul.f32 %v2729_v41, %v600_v49  ;;  %v2966_v49 = vmov 48  }
 0x180   : > { %v592_v58 = vmul.f32 %v2731_v42, %v591_v52 }
 0x181   : > { %v2733_v46 = vpop.eup %2732 }
 0x182   : > { %v2735_v48 = vpop.eup %2734  ;;  %v559_v50 = vadd.f32 1.0, %v2733_v46 }
 0x183   : > { %v560_v53 = vadd.f32 1.0, %v2735_v48 }
 0x184   : > { %2740 = vrcp.f32 %v559_v50 }
 0x185   : > { %2742 = vrcp.f32 %v560_v53 }
 0x187   : > { %v2737_v56 = vpop.eup %2736 }
 0x188   : > { %v2739_v59 = vpop.eup %2738  ;;  %v598_v61 = vmul.f32 0.6931472, %v2737_v56 }
 0x189   : > { %v589_v2 = vmul.f32 0.6931472, %v2739_v59 }
 0x18a   : > { %v604_v4 = vsel %vm603_vm9, %v601_v55, %v598_v61 }
 0x18b   : > { %v595_v6 = vsel %vm594_vm10, %v592_v58, %v589_v2  ;;  %v606_v8 = vadd.f32 %v604_v4, %v574_v63 }
 0x18c   : > { %v605_v7 = vadd.f32 %v595_v6, %v573_v62 }
 0x18d   : > { %v608_v16 = vsel %vm576_vm12, %v3263_v60, %v606_v8 }
 0x18e   : > { %v2741_v10 = vpop.eup %2740  ;;  %v607_v11 = vsel %vm575_vm11, %v3265_v1, %v605_v7  ;;  %v614_v60 = vmul.f32 %v612_v5, %v608_v16 }
 0x18f   : > { %v2743_v12 = vpop.eup %2742  ;;  %v613_v13 = vmul.f32 %v612_v5, %v607_v11  ;;  %v565_v14 = vmul.f32 %v2741_v10, %v551_v36  ;;  %v622_v36 = vmul.u32 16, %v3230_v24 }
 0x190   : > { %v566_v15 = vmul.f32 %v2743_v12, %v552_v37  ;;  %v1379_v37 = vrot.slane %v614_v60, 7 }
 0x191   : > { %v629_v17 = vrot.slane %v613_v13, 7  ;;  %728 = vrot.lane.b32.xlu0 %v565_v14, %s2962_s22  ;;  %v615_v18 = vmul.f32 %v607_v11, %v565_v14  ;;  %v3292_v19 = vmul.f32 %v2123_v9, %v565_v14  ;;  %vm623_vm1 = vcmp.eq.s32.totalorder %v3302_v35, %v622_v36 }
 0x192   : > { %v3294_v26 = vmul.f32 %v608_v16, %v566_v15  ;;  %v3296_v20 = vmul.f32 %v2123_v9, %v566_v15  ;;  %v1381_v42 = vsel %vm631_vm13, 0.0, %v1379_v37  ;;  %v3314_v23 = vsel %vm623_vm1, 1.0, %v2958_v0 }
 0x193   : > { %v632_v1 = vsel %vm631_vm13, 0.0, %v629_v17  ;;  %v1382_v44 = vadd.f32 %v1381_v42, %v614_v60 }
 0x194   : > { %v633_v30 = vadd.f32 %v632_v1, %v613_v13 }
 0x195   : > { %726 = vrot.lane.b32.xlu0 %v565_v14, %s2963_s23  ;;  %v1384_v48 = vrot.slane %v1382_v44, 6 }
 0x196   : > { %v635_v31 = vrot.slane %v633_v30, 6 }
 0x197   : > { %v1386_v50 = vsel %vm637_vm14, 0.0, %v1384_v48 }
 0x198   : > { %v638_v33 = vsel %vm637_vm14, 0.0, %v635_v31  ;;  %v1387_v51 = vadd.f32 %v1386_v50, %v1382_v44  ;;  %v627_v50 = vld [vmem:[#allocation2 + $0x8] sm:$0xff] }
 0x199   : > { %v639_v34 = vadd.f32 %v638_v33, %v633_v30 }
 0x19a   : > { %v1389_v53 = vrot.slane %v1387_v51, 4 }
 0x19b   : > { %v641_v38 = vrot.slane %v639_v34, 4 }
 0x19c   : > { %v1391_v55 = vsel %vm643_vm15, 0.0, %v1389_v53  ;;  %v2969_v53 = vmov 0.0|0.0  }
 0x19d   : > { %v644_v40 = vsel %vm643_vm15, 0.0, %v641_v38  ;;  %v3336_v56 = vadd.f32 %v1391_v55, %v1387_v51 }
 0x19e   : > { %v3307_v41 = vadd.f32 %v644_v40, %v639_v34 }
 0x1a0   : > { %806 = vperm.xlu1 %2719, %v3307_v41   ;;  %2494 = vmatpush3.xpose.msk.msra.mxu1 %vm289_vm2, %v3307_v41  ;;  %v1251_v43 = vrot.slane %v3307_v41, %v3280_v3 }
 0x1a1   : > { %893 = vperm.xlu0 %2721, %v3307_v41   ;;  %2503 = vmatprep.subr.mxu1 %v2958_v0 }
 0x1a2   : > { %v1252_v45 = vsub.f32 %v1251_v43, %v3307_v41 }
 0x1a3   : > { %2496 = vmatmul.mubr.msk.f32.vlgmr.msra.gmra.mrb[0].mxu1 %vm289_vm2, %v3314_v23 }
 0x1a4   : > { %2720 = vset.pattern.permute.xlu1 %v2964_v47  ;;  %2504 = vmatpush3.msra.mxu1 %v615_v18  ;;  %v1253_v46 = vmul.f32 1.442695, %v1252_v45 }
 0x1a5   : > { %906 = vrot.lane.b32.xlu0 %v615_v18, %s2965_s24  ;;  %983 = vperm.xlu1 %2720, %v3307_v41  }
 0x1a6   : > { %2505 = vmatprep.mubr.msk.f32.mxu1 %vm2961_vm3, %v2958_v0  ;;  %2513 = vmatprep.subr.mxu1 %v2958_v0  ;;  %2744 = vpow2.f32 %v1253_v46 }
 0x1a9   : > { %1471 = vrot.lane.b32.xlu0 %v566_v15, %s2962_s22  ;;  %2722 = vset.pattern.permute.xlu1 %v2966_v49 }
 0x1aa   : > { %1072 = vperm.xlu1 %2722, %v3307_v41  }
 0x1ae   : > { %995 = vrot.lane.b32.xlu1 %v615_v18, %s2967_s29 }
 0x1af   : > { %2723 = vset.pattern.permute.xlu1 %v2960_v22 }
 0x1b0   : > { %v2745_v52 = vpop.eup %2744 }
 0x1b1   : > { %v3332_v54 = vmul.f32 %v2745_v52, %v615_v18 }
 0x1b2   : > { %1084 = vrot.lane.b32.xlu1 %v615_v18, %s2968_s9 }
 0x1b6   : > { %1469 = vrot.lane.b32.xlu1 %v566_v15, %s2963_s23 }
 0x1ba   : > { %1548 = vperm.xlu1 %2723, %v3336_v56  }
 0x1be   : > { %2724 = vset.pattern.permute.xlu1 %v2959_v21 }
 0x1bf   : > { %1634 = vperm.xlu1 %2724, %v3336_v56  }
 0x1c3   : > { %2725 = vset.pattern.permute.xlu1 %v2964_v47 }
 0x1c4   : > { %1724 = vperm.xlu1 %2725, %v3336_v56  }
 0x1c8   : > { %2726 = vset.pattern.permute.xlu1 %v2966_v49 }
 0x1c9   : > { %1813 = vperm.xlu1 %2726, %v3336_v56  }
 0x1cd   : > { %1647 = vrot.lane.b32.xlu1 %v3294_v26, %s2965_s24 }
 0x1d1   : > { %1736 = vrot.lane.b32.xlu1 %v3294_v26, %s2967_s29 }
 0x1d5   : > { %1825 = vrot.lane.b32.xlu1 %v3294_v26, %s2968_s9 }
 0x203   : > { %v729_v22 = vpop.permute.xlu0 %728 }
 0x204   : > { %2499 = vmatpush3.xpose.msk.msra.mxu0 %vm730_vm4, %v729_v22  ;;  %1263 = vxpose.xlu0.b32.start.end [1/1] (short) (narrow) %v729_v22, 16 }
 0x205   : > { %2508 = vmatprep.subr.mxu0 %v2958_v0 }
 0x207   : > { %v3349_v21 = vpop.permute.xlu0 %726 }
 0x208   : > { %2501 = vmatmul.mubr.msk.f32.vlgmr.msra.gmra.mrb[6].mxu0 %vm730_vm4, %v3349_v21 }
 0x209   : > { %2510 = vmatprep.mubr.msk.f32.mxu0 %vm2961_vm3, %v2958_v0 }
 0x21f   : > { %v807_v62 = vpop.permute.xlu1 %806 }
 0x220   : > { %v894_v57 = vpop.permute.xlu0 %893 }
 0x224   : > { %v907_v58 = vpop.permute.xlu0 %906  ;;  %v984_v63 = vpop.permute.xlu1 %983 }
 0x225   : > { %2509 = vmatpush3.msra.mxu0 %v907_v58 }
 0x226   : > { %2518 = vmatprep.subr.mxu0 %v2958_v0 }
 0x228   : > { %v3378_v36 = vpop.permute.xlu0 %1471 }
 0x229   : > { %v1073_v2 = vpop.permute.xlu1 %1072 }
 0x22d   : > { %2727 = vset.pattern.permute.xlu0 %v2966_v49  ;;  %v996_v11 = vpop.permute.xlu1 %995  ;;  %v626_v49 = vld [vmem:[#allocation2] sm:$0xff] }
 0x22e   : > { %v2604_v51 = vpack.c.bf16 %v627_v50, %v626_v49 }
 0x231   : > { %v1085_v18 = vpop.permute.xlu1 %1084 }
 0x235   : > { %v3374_v60 = vpop.permute.xlu1 %1469 }
 0x239   : > { %v3376_v33 = vpop.permute.xlu1 %1548 }
 0x23e   : > { %v3380_v40 = vpop.permute.xlu1 %1634 }
 0x243   : > { %v3387_v52 = vpop.permute.xlu1 %1724 }
 0x248   : > { %v1814_v22 = vpop.permute.xlu1 %1813 }
 0x276   : > { %v721_v59 = vpop.f32.mrb[0].mxu1 }
 0x277   : > { %v2497_v61 = vpop.f32.mrb[1].mxu1  ;;  %v812_v4 = vrot.slane %v721_v59, %v3238_v27  ;;  %v899_v5 = vrot.slane %v721_v59, %v3233_v25  ;;  %v989_v6 = vrot.slane %v721_v59, %v3243_v29  ;;  %v1078_v7 = vrot.slane %v721_v59, %v3246_v32 }
 0x279   : > { %v813_v8 = vsub.f32 %v807_v62, %v812_v4  ;;  %v900_v10 = vsub.f32 %v894_v57, %v899_v5  ;;  %v990_v12 = vsub.f32 %v984_v63, %v989_v6  ;;  %v1079_v13 = vsub.f32 %v1073_v2, %v1078_v7 }
 0x27b   : > { %v814_v14 = vsel %vm3362_vm5, %v813_v8, -1e+30  ;;  %v901_v15 = vsel %vm3362_vm5, %v900_v10, -1e+30  ;;  %v991_v16 = vsel %vm3362_vm5, %v990_v12, -1e+30 }
 0x27c   : > { %v815_v17 = vmul.f32 1.442695, %v814_v14  ;;  %v1080_v24 = vsel %vm3362_vm5, %v1079_v13, -1e+30  ;;  %v902_v1 = vmul.f32 1.442695, %v901_v15  ;;  %v1991_v14 = vrot.slane %v3336_v56, %v3280_v3 }
 0x27d   : > { %v992_v30 = vmul.f32 1.442695, %v991_v16  ;;  %v1081_v31 = vmul.f32 1.442695, %v1080_v24 }
 0x27e   : > { %2746 = vpow2.f32 %v815_v17  ;;  %v1992_v17 = vsub.f32 %v1991_v14, %v3336_v56 }
 0x27f   : > { %2748 = vpow2.f32 %v902_v1 }
 0x280   : > { %2750 = vpow2.f32 %v992_v30 }
 0x281   : > { %2752 = vpow2.f32 %v1081_v31 }
 0x284   : > { %v1279_v48 = vpop.trf.xlu0 }
 0x288   : > { %v2747_v34 = vpop.eup %2746  ;;  %v1280_v55 = vpop.trf.xlu0 }
 0x289   : > { %v2749_v35 = vpop.eup %2748 }
 0x28a   : > { %v2751_v37 = vpop.eup %2750 }
 0x28b   : > { %v2753_v38 = vpop.eup %2752 }
 0x2db   : > { %v801_v42 = vpop.f32.mrb[6].mxu0 }
 0x2dc   : > { %v817_v43 = vmul.f32 %v2747_v34, %v801_v42  ;;  %v904_v44 = vmul.f32 %v2749_v35, %v801_v42  ;;  %v994_v45 = vmul.f32 %v2751_v37, %v801_v42  ;;  %v1083_v47 = vmul.f32 %v2753_v38, %v801_v42  ;;  %v2502_v46 = vpop.f32.mrb[7].mxu0 }
 0x2dd   : > { %v1993_v37 = vmul.f32 1.442695, %v1992_v17 }
 0x2de   : > { %2506 = vmatmul.mubr.msk.f32.vlgmr.msra.gmra.mrb[2].mxu1 %vm818_vm6, %v817_v43  ;;  %2511 = vmatmul.mubr.msk.f32.vlgmr.msra.gmra.mrb[8].mxu0 %vm818_vm6, %v904_v44 }
 0x2df   : > { %2514 = vmatpush3.msra.mxu1 %v996_v11  ;;  %2519 = vmatpush3.msra.mxu0 %v1085_v18 }
 0x2e0   : > { %2530 = vmatprep.subr.mxu0 %v3332_v54  ;;  %2520 = vmatprep.mubr.msk.f32.mxu0 %vm2961_vm3, %v2958_v0 }
 0x2e1   : > { %2515 = vmatprep.mubr.msk.f32.mxu1 %vm2961_vm3, %v2958_v0  ;;  %2603 = vmatprep.subr.bf16.mxu1 %v2969_v53 }
 0x2e2   : > { %2516 = vmatmul.mubr.msk.f32.vlgmr.msra.gmra.mrb[4].mxu1 %vm818_vm6, %v994_v45  ;;  %2521 = vmatmul.mubr.msk.f32.vlgmr.msra.gmra.mrb[10].mxu0 %vm818_vm6, %v1083_v47 }
 0x2e3   : > { %2605 = vmatpush3.bf16.msra.mxu1 %v2604_v51  ;;  %2531 = vmatpush3.msra.mxu0 %v3332_v54  ;;  %v1648_v54 = vpop.permute.xlu1 %1647 }
 0x2e4   : > { %2527 = vmatprep.mubr.msk.f32.mxu1 %vm2961_vm3, %v2958_v0  ;;  %2532 = vmatprep.mubr.msk.f32.mxu0 %vm818_vm6, %v1279_v48 }
 0x2e5   : > { %2540 = vmatprep.subr.mxu0 %v2958_v0  ;;  %2535 = vmatprep.subr.mxu1 %v2958_v0 }
 0x2e6   : > { %2528 = vmatmul.mubr.msk.f32.vlgmr.msra.gmra.mrb[6].mxu1 %vm730_vm4, %v3349_v21  ;;  %2533 = vmatmul.mubr.msk.f32.vlgmr.msra.gmra.mrb[12].mxu0 %vm818_vm6, %v1280_v55  ;;  %v646_v21 = vmul.f32 1.442695, %v3307_v41 }
 0x2e7   : > { %2542 = vmatprep.mubr.msk.f32.mxu0 %vm2961_vm3, %v2958_v0  ;;  %2537 = vmatprep.mubr.msk.f32.mxu1 %vm2961_vm3, %v2958_v0  ;;  %v1737_v46 = vpop.permute.xlu1 %1736 }
 0x2e8   : > { %2754 = vpow2.f32 %v646_v21 }
 0x2e9   : > { %2756 = vpow2.f32 %v1993_v37 }
 0x2ea   : > { %2541 = vmatpush3.xpose.msk.msra.mxu0 %vm730_vm4, %v3378_v36 }
 0x2eb   : > { %2550 = vmatprep.subr.mxu0 %v2958_v0  ;;  %v1826_v21 = vpop.permute.xlu1 %1825 }
 0x2ec   : > { %2536 = vmatpush3.xpose.msk.msra.mxu1 %vm289_vm2, %v3336_v56 }
 0x2ed   : > { %2543 = vmatmul.mubr.msk.f32.vlgmr.msra.gmra.mrb[14].mxu0 %vm730_vm4, %v3374_v60  ;;  %2545 = vmatprep.subr.mxu1 %v2958_v0 }
 0x2ee   : > { %2551 = vmatpush3.msra.mxu0 %v1648_v54  ;;  %2552 = vmatprep.mubr.msk.f32.mxu0 %vm2961_vm3, %v2958_v0 }
 0x2ef   : > { %2538 = vmatmul.mubr.msk.f32.vlgmr.msra.gmra.mrb[8].mxu1 %vm289_vm2, %v3314_v23  ;;  %2560 = vmatprep.subr.mxu0 %v2958_v0 }
 0x2f0   : > { %2546 = vmatpush3.msra.mxu1 %v3294_v26  ;;  %2547 = vmatprep.mubr.msk.f32.mxu1 %vm2961_vm3, %v2958_v0 }
 0x2f1   : > { %2555 = vmatprep.subr.mxu1 %v2958_v0 }
 0x2f2   : > { %v3425_v57 = vpop.eup %2754 }
 0x2f3   : > { %v1258_v62 = vrot.slane %v3425_v57, %v3280_v3  ;;  %v2757_v48 = vpop.eup %2756 }
 0x2f4   : > { %v2001_v9 = vmul.f32 %v2757_v48, %v3294_v26  ;;  %v2422_v26 = vmul.f32 -1.442695, %v3240_v28 }
 0x2f5   : > { %v1260_v5 = vmul.f32 %v1258_v62, %v627_v50  ;;  %v1259_v8 = vmul.f32 %v1258_v62, %v626_v49 }
 0x3b1   : > { %v3427_v58 = vpop.f32.mrb[2].mxu1  ;;  %v978_v59 = vpop.f32.mrb[8].mxu0 }
 0x3b2   : > { %v2512_v61 = vpop.f32.mrb[9].mxu0  ;;  %1161 = vrot.lane.b32.xlu1 %v978_v59, %s2970_s25  ;;  %v2507_v23 = vpop.f32.mrb[3].mxu1 }
 0x3b5   : > { %v1067_v63 = vpop.f32.mrb[4].mxu1  ;;  %v1156_v2 = vpop.f32.mrb[10].mxu0 }
 0x3b6   : > { %v2522_v4 = vpop.f32.mrb[11].mxu0  ;;  %1165 = vrot.lane.b32.xlu1 %v1067_v63, %s2971_s6  ;;  %v2517_v41 = vpop.f32.mrb[5].mxu1 }
 0x3b9   : > { %v3433_v6 = vpop.f32.mrb[6].mxu1  ;;  %v2534_v7 = vpop.f32.mrb[12].mxu0 }
 0x3ba   : > { %v3435_v10 = vadd.f32 %v2534_v7, %v1260_v5  ;;  %v1367_v11 = vpop.f32.mrb[13].mxu0  ;;  %1169 = vrot.lane.b32.xlu1 %v1156_v2, %s2963_s23  ;;  %v2529_v12 = vpop.f32.mrb[7].mxu1  ;;  %v1246_v2 = vmul.f32 %v3425_v57, %v3433_v6 }
 0x3bb   : > { %v3438_v13 = vadd.f32 %v1367_v11, %v1259_v8 }
 0x3bd   : > { %v2607_v15 = vpack.c.bf16 %v3435_v10, %v3438_v13 }
 0x3c0   : > { %v1543_v16 = vpop.f32.mrb[14].mxu0 }
 0x3c1   : > { %v2544_v24 = vpop.f32.mrb[15].mxu0 }
 0x3c2   : > { %v1464_v18 = vpop.f32.mrb[8].mxu1 }
 0x3c3   : > { %v1554_v1 = vrot.slane %v1464_v18, %v3238_v27  ;;  %v1640_v30 = vrot.slane %v1464_v18, %v3233_v25  ;;  %v1730_v31 = vrot.slane %v1464_v18, %v3243_v29  ;;  %v1819_v34 = vrot.slane %v1464_v18, %v3246_v32  ;;  %v2539_v35 = vpop.f32.mrb[9].mxu1 }
 0x3c5   : > { %v1555_v38 = vsub.f32 %v3376_v33, %v1554_v1  ;;  %v1641_v42 = vsub.f32 %v3380_v40, %v1640_v30  ;;  %v1731_v43 = vsub.f32 %v3387_v52, %v1730_v31  ;;  %v1820_v44 = vsub.f32 %v1814_v22, %v1819_v34 }
 0x3c6   : > { %v1393_v30 = vmul.f32 1.442695, %v3336_v56 }
 0x3c7   : > { %v1556_v45 = vsel %vm3362_vm5, %v1555_v38, -1e+30  ;;  %v1642_v27 = vsel %vm3362_vm5, %v1641_v42, -1e+30  ;;  %v1732_v25 = vsel %vm3362_vm5, %v1731_v43, -1e+30 }
 0x3c8   : > { %v1557_v29 = vmul.f32 1.442695, %v1556_v45  ;;  %v1643_v32 = vmul.f32 1.442695, %v1642_v27  ;;  %v1733_v47 = vmul.f32 1.442695, %v1732_v25 }
 0x3c9   : > { %v1821_v33 = vsel %vm3362_vm5, %v1820_v44, -1e+30 }
 0x3ca   : > { %2758 = vpow2.f32 %v1557_v29  ;;  %v1822_v40 = vmul.f32 1.442695, %v1821_v33  ;;  %v2146_v33 = vld [vmem:[#allocation9 + $0x10] sm:$0xff] }
 0x3cb   : > { %2760 = vpow2.f32 %v1643_v32 }
 0x3cc   : > { %2762 = vpow2.f32 %v1733_v47  ;;  %v2145_v47 = vld [vmem:[#allocation9 + $0x8] sm:$0xff] }
 0x3cd   : > { %2764 = vpow2.f32 %v1822_v40  ;;  %v2147_v40 = vld [vmem:[#allocation9 + $0x18] sm:$0xff] }
 0x3ce   : > { %2766 = vpow2.f32 %v2422_v26 }
 0x3d4   : > { %v2759_v49 = vpop.eup %2758 }
 0x3d5   : > { %v2761_v50 = vpop.eup %2760  ;;  %v1559_v51 = vmul.f32 %v2759_v49, %v1543_v16 }
 0x3d6   : > { %v2763_v52 = vpop.eup %2762  ;;  %v1645_v55 = vmul.f32 %v2761_v50, %v1543_v16 }
 0x3d7   : > { %v2765_v22 = vpop.eup %2764  ;;  %2548 = vmatmul.mubr.msk.f32.vlgmr.msra.gmra.mrb[10].mxu1 %vm818_vm6, %v1559_v51  ;;  %v1735_v54 = vmul.f32 %v2763_v52, %v1543_v16 }
 0x3d8   : > { %2553 = vmatmul.mubr.msk.f32.vlgmr.msra.gmra.mrb[16].mxu0 %vm818_vm6, %v1645_v55  ;;  %2556 = vmatpush3.msra.mxu1 %v1737_v46  ;;  %v1824_v59 = vmul.f32 %v2765_v22, %v1543_v16  ;;  %v2767_v61 = vpop.eup %2766 }
 0x3d9   : > { %2561 = vmatpush3.msra.mxu0 %v1826_v21  ;;  %2557 = vmatprep.mubr.msk.f32.mxu1 %vm2961_vm3, %v2958_v0  ;;  %v2134_v23 = vadd.f32 1.0, %v2767_v61 }
 0x3da   : > { %2572 = vmatprep.subr.mxu0 %v2001_v9  ;;  %2562 = vmatprep.mubr.msk.f32.mxu0 %vm2961_vm3, %v2958_v0 }
 0x3db   : > { %2606 = vmatprep.subr.bf16.mxu1 %v2969_v53  ;;  %2558 = vmatmul.mubr.msk.f32.vlgmr.msra.gmra.mrb[12].mxu1 %vm818_vm6, %v1735_v54  ;;  %2768 = vrcp.f32 %v2134_v23 }
 0x3dc   : > { %2563 = vmatmul.mubr.msk.f32.vlgmr.msra.gmra.mrb[18].mxu0 %vm818_vm6, %v1824_v59  ;;  %2608 = vmatpush3.bf16.msra.mxu1 %v2607_v15 }
 0x3dd   : > { %2573 = vmatpush3.msra.mxu0 %v2001_v9  ;;  %2569 = vmatprep.mubr.msk.f32.mxu1 %vm2961_vm3, %v2958_v0  ;;  %vm2610_vm3 = vmpackc.low %vm289_vm2, %vm289_vm2 }
 0x3df   : > { %2570 = vmatmul.mubr.msk.f32.vlgmr.msra.gmra.mrb[14].mxu1 %vm730_vm4, %v3374_v60 }
 0x3e5   : > { %v2769_v41 = vpop.eup %2768 }
 0x3e6   : > { %v2140_v7 = vmul.f32 %v2769_v41, %v3240_v28  ;;  %v2144_v28 = vld [vmem:[#allocation9] sm:$0xff] }
 0x3e7   : > { %2581 = vmatprep.mubr.msk.f32.mxu1 %vm289_vm2, %v2144_v28 }
 0x424   : > { %v1162_v62 = vpop.permute.xlu1 %1161 }
 0x425   : > { %v1172_v63 = vsel %vm730_vm4, %v3427_v58, %v1162_v62 }
 0x428   : > { %v1166_v53 = vpop.permute.xlu1 %1165 }
 0x429   : > { %v1173_v0 = vsel %vm309_vm0, %v1172_v63, %v1166_v53 }
 0x42c   : > { %v1170_v4 = vpop.permute.xlu1 %1169 }
 0x42d   : > { %v1175_v60 = vsel %vm1174_vm7, %v1173_v0, %v1170_v4 }
 0x42e   : > { %v1247_v5 = vadd.f32 %v1246_v2, %v1175_v60 }
 0x430   : > { %v2126_v8 = vadd.f32 %v3292_v19, %v1247_v5  ;;  %v2423_v19 = vmul.f32 -1.442695, %v3256_v39 }
 0x432   : > { %v2142_v11 = vmul.f32 %v2140_v7, %v2126_v8  ;;  %2770 = vpow2.f32 %v2423_v19 }
 0x433   : > { %2772 = vpow2.f32 %v1393_v30 }
 0x43c   : > { %v2771_v1 = vpop.eup %2770 }
 0x43d   : > { %v2135_v31 = vadd.f32 1.0, %v2771_v1  ;;  %v2773_v37 = vpop.eup %2772 }
 0x43e   : > { %v1998_v51 = vrot.slane %v2773_v37, %v3280_v3 }
 0x43f   : > { %2774 = vrcp.f32 %v2135_v31 }
 0x440   : > { %v2000_v52 = vmul.f32 %v1998_v51, %v3435_v10  ;;  %v1999_v22 = vmul.f32 %v1998_v51, %v3438_v13 }
 0x449   : > { %v2775_v44 = vpop.eup %2774 }
 0x44a   : > { %v2141_v25 = vmul.f32 %v2775_v44, %v3256_v39 }
 0x4aa   : > { %v1629_v12 = vpop.f32.mrb[10].mxu1 }
 0x4ab   : > { %v1719_v14 = vpop.f32.mrb[16].mxu0  ;;  %v2549_v15 = vpop.f32.mrb[11].mxu1 }
 0x4ac   : > { %1902 = vrot.lane.b32.xlu0 %v1719_v14, %s2970_s25  ;;  %v2554_v58 = vpop.f32.mrb[17].mxu0 }
 0x4ae   : > { %v1808_v16 = vpop.f32.mrb[12].mxu1 }
 0x4af   : > { %v1897_v57 = vpop.f32.mrb[18].mxu0  ;;  %1906 = vrot.lane.b32.xlu1 %v1808_v16, %s2971_s6  ;;  %v2559_v6 = vpop.f32.mrb[13].mxu1 }
 0x4b0   : > { %v2564_v17 = vpop.f32.mrb[19].mxu0 }
 0x4b2   : > { %v1982_v24 = vpop.f32.mrb[14].mxu1 }
 0x4b3   : > { %1910 = vrot.lane.b32.xlu1 %v1897_v57, %s2963_s23  ;;  %v2571_v18 = vpop.f32.mrb[15].mxu1  ;;  %v1986_v42 = vmul.f32 %v2773_v37, %v1982_v24 }
 0x4dc   : > { %2003 = vxpose.xlu1.b32.start.end [1/1] (short) (narrow) %v3378_v36, 16 }
 0x51e   : > { %v1903_v34 = vpop.permute.xlu0 %1902 }
 0x51f   : > { %v1913_v38 = vsel %vm730_vm4, %v1629_v12, %v1903_v34 }
 0x521   : > { %v1907_v35 = vpop.permute.xlu1 %1906 }
 0x522   : > { %v1914_v36 = vsel %vm309_vm0, %v1913_v38, %v1907_v35 }
 0x525   : > { %v1911_v43 = vpop.permute.xlu1 %1910 }
 0x526   : > { %v1915_v45 = vsel %vm1174_vm7, %v1914_v36, %v1911_v43 }
 0x527   : > { %v1987_v27 = vadd.f32 %v1986_v42, %v1915_v45 }
 0x529   : > { %v2127_v56 = vadd.f32 %v3296_v20, %v1987_v27 }
 0x52b   : > { %v2143_v29 = vmul.f32 %v2141_v25, %v2127_v56 }
 0x52d   : > { %v2609_v32 = vpack.c.bf16 %v2143_v29, %v2142_v11 }
 0x52f   : > { %2611 = vmatprep.subr.msk.bf16.mxu1 %vm2610_vm3, %v2609_v32 }
 0x530   : > { %2614 = vmatpush3.bf16.xpose.msk.msra.mxu1 %vm2610_vm3, %v2609_v32 }
 0x537   : > { %2582 = vmatmul.mubr.msk.f32.vlgmr.msra.gmra.mrb[16].mxu1 %vm289_vm2, %v2145_v47 }
 0x538   : > { %2584 = vmatprep.mubr.msk.f32.mxu1 %vm289_vm2, %v2146_v33 }
 0x53b   : > { %2585 = vmatmul.mubr.msk.f32.gmra.mrb[18].mxu1 %vm289_vm2, %v2147_v40 }
 0x55c   : > { %v2019_v39 = vpop.trf.xlu1 }
 0x55d   : > { %2574 = vmatprep.mubr.msk.f32.mxu0 %vm818_vm6, %v2019_v39 }
 0x560   : > { %v2020_v20 = vpop.trf.xlu1 }
 0x561   : > { %2575 = vmatmul.mubr.msk.f32.vlgmr.msra.gmra.mrb[20].mxu0 %vm818_vm6, %v2020_v20 }
 0x60a   : > { %v2583_v46 = vpop.f32.mrb[16].mxu1 }
 0x60b   : > { %2252 = vst.msk [vmem:[%s284_s15 + $0x8] sm:$0xff] %vm730_vm4, %v2583_v46  ;;  %v2232_v48 = vpop.f32.mrb[17].mxu1 }
 0x60c   : > { %2251 = vst.msk [vmem:[%s284_s15] sm:$0xff] %vm730_vm4, %v2232_v48 }
 0x60e   : > { %v2586_v49 = vpop.f32.mrb[18].mxu1 }
 0x60f   : > { %2254 = vst.msk [vmem:[%s284_s15 + $0x18] sm:$0xff] %vm730_vm4, %v2586_v49  ;;  %v2242_v50 = vpop.f32.mrb[19].mxu1 }
 0x610   : > { %2253 = vst.msk [vmem:[%s284_s15 + $0x10] sm:$0xff] %vm730_vm4, %v2242_v50 }
 0x634   : > { %v2576_v55 = vpop.f32.mrb[20].mxu0 }
 0x635   : > { %v2117_v54 = vadd.f32 %v2576_v55, %v2000_v52  ;;  %v2107_v21 = vpop.f32.mrb[21].mxu0 }
 0x636   : > { %v2116_v9 = vadd.f32 %v2107_v21, %v1999_v22 }
 0x637   : > { %2119 = vst.msk [vmem:[#allocation2 + $0x8] sm:$0xff] %vm289_vm2, %v2117_v54 }
 0x638   : > { %2118 = vst.msk [vmem:[#allocation2] sm:$0xff] %vm289_vm2, %v2116_v9 }
 0x639 PF: > { %s19_s20 = sadd.s32 1, %s2948_s20   ;;  %s3554_s15 = smov %s2932_s16 }
 0x63a   : > { %p16_p4 = scmp.ge.s32.totalorder %s19_s20, 4   ;;  %s3555_s16 = smov %s2936_s17 }
 0x63b   : > { %s3556_s17 = smov %s3144_s28  ;;  %s3557_s18 = smov %s2944_s19 }
 0x63c   : > { %s3558_s19 = smov %s3560_s12  ;;  %18 = sbr.rel (!%p16_p4) target bundleno = 6 (0x6), region = 92 }
 0x643   :  { %2282 = vsyncpa [#allocation5], 1 }
 0x644   :  { %2284 = vsyncpa [#allocation5 + $0x1], 1 }
 0x645   :  { %2285 = vsyncpa [#allocation7], 1 }
 0x646   :  { %2286 = vsyncpa [#allocation10], 1 }

</bundles_post_ra>
